<compile_context>
chip_gen: v7x
topology: tpu7x:2x2x1
jax: 0.10.0
libtpu: 0.0.40
codegen_flags: <defaults>
</compile_context>

<pallas_src>
import functools
import math

import jax
import jax.numpy as jnp
from jax import lax
from jax.experimental import pallas as pl
from jax.experimental.pallas import tpu as pltpu


# ----------------------------------------------------------------------------- helpers
_CONTRACT_LAST = (((1,), (1,)), ((), ()))   # dot_general: contract last axis of both operands
_CONTRACT_1_0 = (((1,), (0,)), ((), ()))    # dot_general: standard (M,K)x(K,N)


def _layernorm_f32(h, g, b, eps=1e-5):
    """LayerNorm over the last axis, all stats in f32 (matches nn.LayerNorm, eps=1e-5)."""
    g = g.astype(jnp.float32)
    b = b.astype(jnp.float32)
    mu = jnp.mean(h, axis=-1, keepdims=True)
    c = h - mu
    var = jnp.mean(c * c, axis=-1, keepdims=True)
    return c * lax.rsqrt(var + eps) * g + b


# ----------------------------------------------------------------------------- fused kernel
def _make_fused_kernel(n_layers: int, n_heads: int, head_size: int,
                       seq_len: int, vocab_size: int, emb_size: int):
    scale = 1.0 / math.sqrt(head_size)

    def kernel(ids_ref,                               # SMEM (B, T) int32 (scalar prefetch)
               tok_emb_ref, pos_emb_ref,              # (V, E), (T, E)
               wqkv_ref, wproj_ref,                   # (L, 3*nh*hs, E), (L, E, nh*hs)
               ln1g_ref, ln1b_ref,                    # (L, 1, E) each
               wff1_ref, bff1_ref,                    # (L, 4E, E), (L, 1, 4E)
               wff2_ref, bff2_ref,                    # (L, E, 4E), (L, 1, E)
               ln2g_ref, ln2b_ref,                    # (L, 1, E) each
               wvocab_ref, bvocab_ref,                # (V, E), (1, V)
               o_ref):                                # (T, V) for this batch element
        b = pl.program_id(0)
        T, V = seq_len, vocab_size
        nh, hs = n_heads, head_size
        dt = tok_emb_ref.dtype

        # ---- token embedding gather as a one-hot MXU matmul + positional add -------------
        col_v = lax.broadcasted_iota(jnp.int32, (T, V), 1)
        rows = [jnp.full((1, V), ids_ref[b, t], jnp.int32) for t in range(T)]
        ids_mat = jnp.concatenate(rows, axis=0)                         # (T, V) int32
        onehot = (ids_mat == col_v).astype(dt)
        tok = lax.dot_general(onehot, tok_emb_ref[...], _CONTRACT_1_0,
                              preferred_element_type=jnp.float32)       # (T, E) f32
        x32 = tok + pos_emb_ref[...].astype(jnp.float32)                # running activation, f32

        # Causal mask, built once and shared by every layer / head.
        row_i = lax.broadcasted_iota(jnp.int32, (T, T), 0)
        col_i = lax.broadcasted_iota(jnp.int32, (T, T), 1)
        causal = col_i <= row_i

        # ---- n_layers MultiHead blocks, fully fused ---------------------------------------
        for l in range(n_layers):
            x = x32.astype(dt)

            # Fused q/k/v projection for all heads: x @ W_qkv.T via last-axis contraction.
            qkv = lax.dot_general(x, wqkv_ref[l], _CONTRACT_LAST,
                                  preferred_element_type=jnp.float32)   # (T, 3*nh*hs) f32

            head_outs = []
            for h in range(nh):
                q = (qkv[:, h * hs:(h + 1) * hs] * scale).astype(dt)    # scale folded into q
                k = qkv[:, (nh + h) * hs:(nh + h + 1) * hs].astype(dt)
                v = qkv[:, (2 * nh + h) * hs:(2 * nh + h + 1) * hs].astype(dt)

                # scores = q @ k^T without materializing k.T (contract last axes).
                s = lax.dot_general(q, k, _CONTRACT_LAST,
                                    preferred_element_type=jnp.float32)  # (T, T) f32
                s = jnp.where(causal, s, -1e30)

                # Numerically-stable softmax; divide goes to the EUP as approx reciprocal.
                m = jnp.max(s, axis=-1, keepdims=True)
                e = jnp.exp(s - m)
                denom = jnp.sum(e, axis=-1, keepdims=True)
                p = e * pl.reciprocal(denom, approx=True)

                head_outs.append(jnp.dot(p.astype(dt), v,
                                         preferred_element_type=jnp.float32))  # (T, hs)

            # Lane-dense concat of all heads -> (T, nh*hs), then output projection (no bias).
            attn = jnp.concatenate(head_outs, axis=-1).astype(dt)
            proj = lax.dot_general(attn, wproj_ref[l], _CONTRACT_LAST,
                                   preferred_element_type=jnp.float32)  # (T, E) f32

            # Residual 1 + LayerNorm 1.
            h1 = _layernorm_f32(x32 + proj, ln1g_ref[l], ln1b_ref[l])

            # FeedForward: Linear(E,4E) + ReLU + Linear(4E,E)  (eval-mode dropout = identity).
            a = lax.dot_general(h1.astype(dt), wff1_ref[l], _CONTRACT_LAST,
                                preferred_element_type=jnp.float32)
            a = jnp.maximum(a + bff1_ref[l].astype(jnp.float32), 0.0)
            f = lax.dot_general(a.astype(dt), wff2_ref[l], _CONTRACT_LAST,
                                preferred_element_type=jnp.float32)
            f = f + bff2_ref[l].astype(jnp.float32)

            # Residual 2 uses the ORIGINAL block input (matches the PyTorch module), then LN2.
            x32 = _layernorm_f32(f + x32, ln2g_ref[l], ln2b_ref[l])

        # ---- vocab projection --------------------------------------------------------------
        y = lax.dot_general(x32.astype(dt), wvocab_ref[...], _CONTRACT_LAST,
                            preferred_element_type=jnp.float32)
        y = y + bvocab_ref[...].astype(jnp.float32)
        o_ref[...] = y.astype(o_ref.dtype)

    return kernel


# ----------------------------------------------------------------------------- forward
def transformer_forward(ids, params, *, n_heads, head_size):
    """ids: (B, T) int32 token ids -> logits (B, T, vocab_size). One Pallas kernel."""
    B, T = ids.shape
    V, E = params["tok_emb"].shape
    L = params["w_qkv"].shape[0]
    nhh = n_heads * head_size
    dtype = params["tok_emb"].dtype

    kernel = _make_fused_kernel(L, n_heads, head_size, T, V, E)

    full2 = lambda b, ids_ref: (0, 0)       # resident 2-D weight blocks
    full3 = lambda b, ids_ref: (0, 0, 0)    # resident layer-stacked 3-D weight blocks

    return pl.pallas_call(
        kernel,
        out_shape=jax.ShapeDtypeStruct((B, T, V), dtype),
        grid_spec=pltpu.PrefetchScalarGridSpec(
            num_scalar_prefetch=1,                       # ids -> SMEM
            grid=(B,),
            in_specs=[
                pl.BlockSpec((V, E), full2),             # token embedding table
                pl.BlockSpec((T, E), full2),             # positional embedding table
                pl.BlockSpec((L, 3 * nhh, E), full3),    # stacked q/k/v weights (all layers)
                pl.BlockSpec((L, E, nhh), full3),        # output projections
                pl.BlockSpec((L, 1, E), full3),          # ln1 gamma
                pl.BlockSpec((L, 1, E), full3),          # ln1 beta
                pl.BlockSpec((L, 4 * E, E), full3),      # ff linear 1 weights
                pl.BlockSpec((L, 1, 4 * E), full3),      # ff linear 1 biases
                pl.BlockSpec((L, E, 4 * E), full3),      # ff linear 2 weights
                pl.BlockSpec((L, 1, E), full3),          # ff linear 2 biases
                pl.BlockSpec((L, 1, E), full3),          # ln2 gamma
                pl.BlockSpec((L, 1, E), full3),          # ln2 beta
                pl.BlockSpec((V, E), full2),             # vocab projection weight
                pl.BlockSpec((1, V), full2),             # vocab projection bias
            ],
            out_specs=pl.BlockSpec((None, T, V), lambda b, ids_ref: (b, 0, 0)),
        ),
        compiler_params=pltpu.CompilerParams(
            dimension_semantics=("parallel",),           # batch across v7x's 2 TensorCores
            vmem_limit_bytes=32 * 1024 * 1024,
        ),
    )(ids,
      params["tok_emb"], params["pos_emb"],
      params["w_qkv"], params["w_proj"],
      params["ln1_g"], params["ln1_b"],
      params["w_ff1"], params["b_ff1"], params["w_ff2"], params["b_ff2"],
      params["ln2_g"], params["ln2_b"],
      params["w_vocab"], params["b_vocab"])


# ----------------------------------------------------------------------------- reference
def _layernorm_ref(h, g, b, eps=1e-5):
    mu = jnp.mean(h, axis=-1, keepdims=True)
    var = jnp.mean((h - mu) ** 2, axis=-1, keepdims=True)
    return (h - mu) / jnp.sqrt(var + eps) * g + b


def transformer_reference(ids, params, *, n_heads, head_size):
    """Pure-JAX mirror of the PyTorch forward (eval-mode dropout)."""
    nh, hs = n_heads, head_size
    x = params["tok_emb"][ids] + params["pos_emb"][None, :, :]
    B, T, E = x.shape
    L = params["w_qkv"].shape[0]
    tril = jnp.tril(jnp.ones((T, T)))
    for l in range(L):
        wq = params["w_qkv"][l, : nh * hs].reshape(nh, hs, E)
        wk = params["w_qkv"][l, nh * hs: 2 * nh * hs].reshape(nh, hs, E)
        wv = params["w_qkv"][l, 2 * nh * hs:].reshape(nh, hs, E)
        q = jnp.einsum("bte,nhe->bnth", x, wq)
        k = jnp.einsum("bte,nhe->bnth", x, wk)
        v = jnp.einsum("bte,nhe->bnth", x, wv)
        s = jnp.einsum("bnth,bnsh->bnts", q, k) / math.sqrt(hs)
        s = jnp.where(tril == 0, -jnp.inf, s)
        p = jax.nn.softmax(s, axis=-1)
        o = jnp.einsum("bnts,bnsh->bnth", p, v)
        o = jnp.transpose(o, (0, 2, 1, 3)).reshape(B, T, nh * hs)      # == torch.cat(heads, -1)
        o = jnp.einsum("btf,ef->bte", o, params["w_proj"][l])
        h1 = _layernorm_ref(x + o, params["ln1_g"][l, 0], params["ln1_b"][l, 0])
        a = jax.nn.relu(jnp.einsum("bte,fe->btf", h1, params["w_ff1"][l]) + params["b_ff1"][l, 0])
        f = jnp.einsum("btf,ef->bte", a, params["w_ff2"][l]) + params["b_ff2"][l, 0]
        x = _layernorm_ref(f + x, params["ln2_g"][l, 0], params["ln2_b"][l, 0])
    return jnp.einsum("bte,ve->btv", x, params["w_vocab"]) + params["b_vocab"][0]


# ----------------------------------------------------------------------------- params
def _uniform(key, shape, fan_in):
    bound = 1.0 / math.sqrt(fan_in)
    return jax.random.uniform(key, shape, jnp.float32, -bound, bound)


def init_params(key, *, vocab_size, embedding_size, n_heads, head_size, n_layers, seq_len):
    E, nh, hs, L = embedding_size, n_heads, head_size, n_layers
    ks = jax.random.split(key, 14)
    return {
        "tok_emb": jax.random.normal(ks[0], (vocab_size, E), jnp.float32),
        "pos_emb": jax.random.normal(ks[1], (seq_len, E), jnp.float32),
        # Per-layer weights stacked along a leading layer axis (PyTorch (out, in) layout).
        "w_qkv": _uniform(ks[2], (L, 3 * nh * hs, E), E),   # [q heads; k heads; v heads]
        "w_proj": _uniform(ks[3], (L, E, nh * hs), nh * hs),
        "ln1_g": 1.0 + 0.05 * jax.random.normal(ks[4], (L, 1, E), jnp.float32),
        "ln1_b": 0.05 * jax.random.normal(ks[5], (L, 1, E), jnp.float32),
        "w_ff1": _uniform(ks[6], (L, 4 * E, E), E),
        "b_ff1": _uniform(ks[7], (L, 1, 4 * E), E),
        "w_ff2": _uniform(ks[8], (L, E, 4 * E), 4 * E),
        "b_ff2": _uniform(ks[9], (L, 1, E), 4 * E),
        "ln2_g": 1.0 + 0.05 * jax.random.normal(ks[10], (L, 1, E), jnp.float32),
        "ln2_b": 0.05 * jax.random.normal(ks[11], (L, 1, E), jnp.float32),
        "w_vocab": _uniform(ks[12], (vocab_size, E), E),
        "b_vocab": _uniform(ks[13], (1, vocab_size), E),
    }


# ----------------------------------------------------------------------------- demo
if __name__ == "__main__":
    cfg = dict(vocab_size=64, embedding_size=32, n_heads=4, head_size=8,
               n_layers=2, seq_len=8)
    B = 2

    key = jax.random.PRNGKey(0)
    k_param, k_ids = jax.random.split(key)
    params = init_params(k_param, **cfg)
    ids = jax.random.randint(k_ids, (B, cfg["seq_len"]), 0, cfg["vocab_size"], dtype=jnp.int32)

    fwd = jax.jit(functools.partial(transformer_forward,
                                    n_heads=cfg["n_heads"], head_size=cfg["head_size"]))
    logits = jax.block_until_ready(fwd(ids, params))

    with jax.default_matmul_precision("highest"):
        ref = transformer_reference(ids, params,
                                    n_heads=cfg["n_heads"], head_size=cfg["head_size"])

    assert logits.shape == (B, cfg["seq_len"], cfg["vocab_size"])
    # Tolerance accounts for the EUP approx reciprocal in the softmax and MXU accumulation order.
    assert jnp.allclose(logits, ref, atol=1e-2, rtol=1e-2), \
        f"max abs diff = {float(jnp.max(jnp.abs(logits - ref)))}"

    print("KERNEL_OK")
</pallas_src>

<mosaic_0001>
module attributes {stable_mosaic.version = 11 : i64} {
  func.func @kernel(%arg0: i32, %arg1: memref<2x8xi32, #tpu.memory_space<smem>>, %arg2: memref<64x32xf32, #tpu.memory_space<vmem>>, %arg3: memref<8x32xf32, #tpu.memory_space<vmem>>, %arg4: memref<2x96x32xf32, #tpu.memory_space<vmem>>, %arg5: memref<2x32x32xf32, #tpu.memory_space<vmem>>, %arg6: memref<2x1x32xf32, #tpu.memory_space<vmem>>, %arg7: memref<2x1x32xf32, #tpu.memory_space<vmem>>, %arg8: memref<2x128x32xf32, #tpu.memory_space<vmem>>, %arg9: memref<2x1x128xf32, #tpu.memory_space<vmem>>, %arg10: memref<2x32x128xf32, #tpu.memory_space<vmem>>, %arg11: memref<2x1x32xf32, #tpu.memory_space<vmem>>, %arg12: memref<2x1x32xf32, #tpu.memory_space<vmem>>, %arg13: memref<2x1x32xf32, #tpu.memory_space<vmem>>, %arg14: memref<64x32xf32, #tpu.memory_space<vmem>>, %arg15: memref<1x64xf32, #tpu.memory_space<vmem>>, %arg16: memref<1x8x64xf32, #tpu.memory_space<vmem>>) attributes {dimension_semantics = [#tpu.dimension_semantics<parallel>], iteration_bounds = array<i64: 2>, scalar_prefetch = 1 : i64, scratch_operands = 0 : i64, tpu.core_type = #tpu.core_type<tc>, window_params = [{pipeline_mode = #tpu.pipeline_mode<synchronous>, transform_indices = @transform_0, window_bounds = array<i64: 64, 32>}, {pipeline_mode = #tpu.pipeline_mode<synchronous>, transform_indices = @transform_1, window_bounds = array<i64: 8, 32>}, {pipeline_mode = #tpu.pipeline_mode<synchronous>, transform_indices = @transform_2, window_bounds = array<i64: 2, 96, 32>}, {pipeline_mode = #tpu.pipeline_mode<synchronous>, transform_indices = @transform_3, window_bounds = array<i64: 2, 32, 32>}, {pipeline_mode = #tpu.pipeline_mode<synchronous>, transform_indices = @transform_4, window_bounds = array<i64: 2, 1, 32>}, {pipeline_mode = #tpu.pipeline_mode<synchronous>, transform_indices = @transform_5, window_bounds = array<i64: 2, 1, 32>}, {pipeline_mode = #tpu.pipeline_mode<synchronous>, transform_indices = @transform_6, window_bounds = array<i64: 2, 128, 32>}, {pipeline_mode = #tpu.pipeline_mode<synchronous>, transform_indices = @transform_7, window_bounds = array<i64: 2, 1, 128>}, {pipeline_mode = #tpu.pipeline_mode<synchronous>, transform_indices = @transform_8, window_bounds = array<i64: 2, 32, 128>}, {pipeline_mode = #tpu.pipeline_mode<synchronous>, transform_indices = @transform_9, window_bounds = array<i64: 2, 1, 32>}, {pipeline_mode = #tpu.pipeline_mode<synchronous>, transform_indices = @transform_10, window_bounds = array<i64: 2, 1, 32>}, {pipeline_mode = #tpu.pipeline_mode<synchronous>, transform_indices = @transform_11, window_bounds = array<i64: 2, 1, 32>}, {pipeline_mode = #tpu.pipeline_mode<synchronous>, transform_indices = @transform_12, window_bounds = array<i64: 64, 32>}, {pipeline_mode = #tpu.pipeline_mode<synchronous>, transform_indices = @transform_13, window_bounds = array<i64: 1, 64>}, {transform_indices = @transform_14, window_bounds = array<i64: 1, 8, 64>}]} {
    %0 = tpu.iota {dimensions = array<i32: 1>} : vector<8x64xi32>
    %1 = arith.index_cast %arg0 : i32 to index
    %c0 = arith.constant 0 : index
    %2 = memref.load %arg1[%1, %c0] : memref<2x8xi32, #tpu.memory_space<smem>>
    %3 = vector.broadcast %2 : i32 to vector<1x64xi32>
    %4 = arith.index_cast %arg0 : i32 to index
    %c1 = arith.constant 1 : index
    %5 = memref.load %arg1[%4, %c1] : memref<2x8xi32, #tpu.memory_space<smem>>
    %6 = vector.broadcast %5 : i32 to vector<1x64xi32>
    %7 = arith.index_cast %arg0 : i32 to index
    %c2 = arith.constant 2 : index
    %8 = memref.load %arg1[%7, %c2] : memref<2x8xi32, #tpu.memory_space<smem>>
    %9 = vector.broadcast %8 : i32 to vector<1x64xi32>
    %10 = arith.index_cast %arg0 : i32 to index
    %c3 = arith.constant 3 : index
    %11 = memref.load %arg1[%10, %c3] : memref<2x8xi32, #tpu.memory_space<smem>>
    %12 = vector.broadcast %11 : i32 to vector<1x64xi32>
    %13 = arith.index_cast %arg0 : i32 to index
    %c4 = arith.constant 4 : index
    %14 = memref.load %arg1[%13, %c4] : memref<2x8xi32, #tpu.memory_space<smem>>
    %15 = vector.broadcast %14 : i32 to vector<1x64xi32>
    %16 = arith.index_cast %arg0 : i32 to index
    %c5 = arith.constant 5 : index
    %17 = memref.load %arg1[%16, %c5] : memref<2x8xi32, #tpu.memory_space<smem>>
    %18 = vector.broadcast %17 : i32 to vector<1x64xi32>
    %19 = arith.index_cast %arg0 : i32 to index
    %c6 = arith.constant 6 : index
    %20 = memref.load %arg1[%19, %c6] : memref<2x8xi32, #tpu.memory_space<smem>>
    %21 = vector.broadcast %20 : i32 to vector<1x64xi32>
    %22 = arith.index_cast %arg0 : i32 to index
    %c7 = arith.constant 7 : index
    %23 = memref.load %arg1[%22, %c7] : memref<2x8xi32, #tpu.memory_space<smem>>
    %24 = vector.broadcast %23 : i32 to vector<1x64xi32>
    %25 = tpu.concatenate %3, %6, %9, %12, %15, %18, %21, %24 in 0 : vector<1x64xi32>, vector<1x64xi32>, vector<1x64xi32>, vector<1x64xi32>, vector<1x64xi32>, vector<1x64xi32>, vector<1x64xi32>, vector<1x64xi32> -> vector<8x64xi32>
    %26 = arith.cmpi eq, %25, %0 : vector<8x64xi32>
    %27 = arith.extui %26 : vector<8x64xi1> to vector<8x64xi32>
    %28 = arith.sitofp %27 : vector<8x64xi32> to vector<8x64xf32>
    %c0_0 = arith.constant 0 : index
    %c0_1 = arith.constant 0 : index
    %29 = vector.load %arg2[%c0_0, %c0_1] : memref<64x32xf32, #tpu.memory_space<vmem>>, vector<64x32xf32>
    %cst = arith.constant dense<0.000000e+00> : vector<8x32xf32>
    %30 = tpu.matmul %28, %29, %cst {dimension_numbers = #tpu.dot_dimension_numbers<[1], [0], [0], [1], [0, 0, 1, 1], [], []>} : vector<8x64xf32>, vector<64x32xf32>, vector<8x32xf32> -> vector<8x32xf32>
    %c0_2 = arith.constant 0 : index
    %c0_3 = arith.constant 0 : index
    %31 = vector.load %arg3[%c0_2, %c0_3] : memref<8x32xf32, #tpu.memory_space<vmem>>, vector<8x32xf32>
    %32 = arith.addf %30, %31 : vector<8x32xf32>
    %33 = tpu.iota {dimensions = array<i32: 0>} : vector<8x8xi32>
    %34 = tpu.iota {dimensions = array<i32: 1>} : vector<8x8xi32>
    %35 = arith.cmpi sle, %34, %33 : vector<8x8xi32>
    %c0_4 = arith.constant 0 : index
    %c0_5 = arith.constant 0 : index
    %c0_6 = arith.constant 0 : index
    %36 = vector.load %arg4[%c0_4, %c0_5, %c0_6] : memref<2x96x32xf32, #tpu.memory_space<vmem>>, vector<1x96x32xf32>
    %37 = vector.shape_cast %36 : vector<1x96x32xf32> to vector<96x32xf32>
    %cst_7 = arith.constant dense<0.000000e+00> : vector<8x96xf32>
    %38 = tpu.matmul %32, %37, %cst_7 {dimension_numbers = #tpu.dot_dimension_numbers<[1], [1], [0], [0], [0, 0, 1, 0], [], []>} : vector<8x32xf32>, vector<96x32xf32>, vector<8x96xf32> -> vector<8x96xf32>
    %39 = vector.extract_strided_slice %38 {offsets = [0, 0], sizes = [8, 8], strides = [1, 1]} : vector<8x96xf32> to vector<8x8xf32>
    %cst_8 = arith.constant 0.353553385 : f32
    %40 = vector.broadcast %cst_8 : f32 to vector<8x8xf32>
    %41 = arith.mulf %39, %40 : vector<8x8xf32>
    %42 = vector.extract_strided_slice %38 {offsets = [0, 32], sizes = [8, 8], strides = [1, 1]} : vector<8x96xf32> to vector<8x8xf32>
    %43 = vector.extract_strided_slice %38 {offsets = [0, 64], sizes = [8, 8], strides = [1, 1]} : vector<8x96xf32> to vector<8x8xf32>
    %cst_9 = arith.constant dense<0.000000e+00> : vector<8x8xf32>
    %44 = tpu.matmul %41, %42, %cst_9 {dimension_numbers = #tpu.dot_dimension_numbers<[1], [1], [0], [0], [0, 0, 1, 0], [], []>} : vector<8x8xf32>, vector<8x8xf32>, vector<8x8xf32> -> vector<8x8xf32>
    %cst_10 = arith.constant -1.000000e+30 : f32
    %45 = vector.broadcast %cst_10 : f32 to vector<8x8xf32>
    %46 = arith.select %35, %44, %45 : vector<8x8xi1>, vector<8x8xf32>
    %cst_11 = arith.constant dense<0xFF800000> : vector<8xf32>
    %47 = vector.multi_reduction <maximumf>, %46, %cst_11 [1] : vector<8x8xf32> to vector<8xf32>
    %48 = vector.shape_cast %47 : vector<8xf32> to vector<8x1xf32>
    %49 = vector.broadcast %48 : vector<8x1xf32> to vector<8x8xf32>
    %50 = arith.subf %46, %49 : vector<8x8xf32>
    %51 = math.exp %50 : vector<8x8xf32>
    %cst_12 = arith.constant dense<0.000000e+00> : vector<8xf32>
    %52 = vector.multi_reduction <add>, %51, %cst_12 [1] : vector<8x8xf32> to vector<8xf32>
    %53 = vector.shape_cast %52 : vector<8xf32> to vector<8x1xf32>
    %54 = tpu.reciprocal %53 {approx = true} : vector<8x1xf32> -> vector<8x1xf32>
    %55 = vector.broadcast %54 : vector<8x1xf32> to vector<8x8xf32>
    %56 = arith.mulf %51, %55 : vector<8x8xf32>
    %cst_13 = arith.constant dense<0.000000e+00> : vector<8x8xf32>
    %57 = tpu.matmul %56, %43, %cst_13 {dimension_numbers = #tpu.dot_dimension_numbers<[1], [0], [0], [1], [0, 0, 1, 1], [], []>} : vector<8x8xf32>, vector<8x8xf32>, vector<8x8xf32> -> vector<8x8xf32>
    %58 = vector.extract_strided_slice %38 {offsets = [0, 8], sizes = [8, 8], strides = [1, 1]} : vector<8x96xf32> to vector<8x8xf32>
    %cst_14 = arith.constant 0.353553385 : f32
    %59 = vector.broadcast %cst_14 : f32 to vector<8x8xf32>
    %60 = arith.mulf %58, %59 : vector<8x8xf32>
    %61 = vector.extract_strided_slice %38 {offsets = [0, 40], sizes = [8, 8], strides = [1, 1]} : vector<8x96xf32> to vector<8x8xf32>
    %62 = vector.extract_strided_slice %38 {offsets = [0, 72], sizes = [8, 8], strides = [1, 1]} : vector<8x96xf32> to vector<8x8xf32>
    %cst_15 = arith.constant dense<0.000000e+00> : vector<8x8xf32>
    %63 = tpu.matmul %60, %61, %cst_15 {dimension_numbers = #tpu.dot_dimension_numbers<[1], [1], [0], [0], [0, 0, 1, 0], [], []>} : vector<8x8xf32>, vector<8x8xf32>, vector<8x8xf32> -> vector<8x8xf32>
    %cst_16 = arith.constant -1.000000e+30 : f32
    %64 = vector.broadcast %cst_16 : f32 to vector<8x8xf32>
    %65 = arith.select %35, %63, %64 : vector<8x8xi1>, vector<8x8xf32>
    %cst_17 = arith.constant dense<0xFF800000> : vector<8xf32>
    %66 = vector.multi_reduction <maximumf>, %65, %cst_17 [1] : vector<8x8xf32> to vector<8xf32>
    %67 = vector.shape_cast %66 : vector<8xf32> to vector<8x1xf32>
    %68 = vector.broadcast %67 : vector<8x1xf32> to vector<8x8xf32>
    %69 = arith.subf %65, %68 : vector<8x8xf32>
    %70 = math.exp %69 : vector<8x8xf32>
    %cst_18 = arith.constant dense<0.000000e+00> : vector<8xf32>
    %71 = vector.multi_reduction <add>, %70, %cst_18 [1] : vector<8x8xf32> to vector<8xf32>
    %72 = vector.shape_cast %71 : vector<8xf32> to vector<8x1xf32>
    %73 = tpu.reciprocal %72 {approx = true} : vector<8x1xf32> -> vector<8x1xf32>
    %74 = vector.broadcast %73 : vector<8x1xf32> to vector<8x8xf32>
    %75 = arith.mulf %70, %74 : vector<8x8xf32>
    %cst_19 = arith.constant dense<0.000000e+00> : vector<8x8xf32>
    %76 = tpu.matmul %75, %62, %cst_19 {dimension_numbers = #tpu.dot_dimension_numbers<[1], [0], [0], [1], [0, 0, 1, 1], [], []>} : vector<8x8xf32>, vector<8x8xf32>, vector<8x8xf32> -> vector<8x8xf32>
    %77 = vector.extract_strided_slice %38 {offsets = [0, 16], sizes = [8, 8], strides = [1, 1]} : vector<8x96xf32> to vector<8x8xf32>
    %cst_20 = arith.constant 0.353553385 : f32
    %78 = vector.broadcast %cst_20 : f32 to vector<8x8xf32>
    %79 = arith.mulf %77, %78 : vector<8x8xf32>
    %80 = vector.extract_strided_slice %38 {offsets = [0, 48], sizes = [8, 8], strides = [1, 1]} : vector<8x96xf32> to vector<8x8xf32>
    %81 = vector.extract_strided_slice %38 {offsets = [0, 80], sizes = [8, 8], strides = [1, 1]} : vector<8x96xf32> to vector<8x8xf32>
    %cst_21 = arith.constant dense<0.000000e+00> : vector<8x8xf32>
    %82 = tpu.matmul %79, %80, %cst_21 {dimension_numbers = #tpu.dot_dimension_numbers<[1], [1], [0], [0], [0, 0, 1, 0], [], []>} : vector<8x8xf32>, vector<8x8xf32>, vector<8x8xf32> -> vector<8x8xf32>
    %cst_22 = arith.constant -1.000000e+30 : f32
    %83 = vector.broadcast %cst_22 : f32 to vector<8x8xf32>
    %84 = arith.select %35, %82, %83 : vector<8x8xi1>, vector<8x8xf32>
    %cst_23 = arith.constant dense<0xFF800000> : vector<8xf32>
    %85 = vector.multi_reduction <maximumf>, %84, %cst_23 [1] : vector<8x8xf32> to vector<8xf32>
    %86 = vector.shape_cast %85 : vector<8xf32> to vector<8x1xf32>
    %87 = vector.broadcast %86 : vector<8x1xf32> to vector<8x8xf32>
    %88 = arith.subf %84, %87 : vector<8x8xf32>
    %89 = math.exp %88 : vector<8x8xf32>
    %cst_24 = arith.constant dense<0.000000e+00> : vector<8xf32>
    %90 = vector.multi_reduction <add>, %89, %cst_24 [1] : vector<8x8xf32> to vector<8xf32>
    %91 = vector.shape_cast %90 : vector<8xf32> to vector<8x1xf32>
    %92 = tpu.reciprocal %91 {approx = true} : vector<8x1xf32> -> vector<8x1xf32>
    %93 = vector.broadcast %92 : vector<8x1xf32> to vector<8x8xf32>
    %94 = arith.mulf %89, %93 : vector<8x8xf32>
    %cst_25 = arith.constant dense<0.000000e+00> : vector<8x8xf32>
    %95 = tpu.matmul %94, %81, %cst_25 {dimension_numbers = #tpu.dot_dimension_numbers<[1], [0], [0], [1], [0, 0, 1, 1], [], []>} : vector<8x8xf32>, vector<8x8xf32>, vector<8x8xf32> -> vector<8x8xf32>
    %96 = vector.extract_strided_slice %38 {offsets = [0, 24], sizes = [8, 8], strides = [1, 1]} : vector<8x96xf32> to vector<8x8xf32>
    %cst_26 = arith.constant 0.353553385 : f32
    %97 = vector.broadcast %cst_26 : f32 to vector<8x8xf32>
    %98 = arith.mulf %96, %97 : vector<8x8xf32>
    %99 = vector.extract_strided_slice %38 {offsets = [0, 56], sizes = [8, 8], strides = [1, 1]} : vector<8x96xf32> to vector<8x8xf32>
    %100 = vector.extract_strided_slice %38 {offsets = [0, 88], sizes = [8, 8], strides = [1, 1]} : vector<8x96xf32> to vector<8x8xf32>
    %cst_27 = arith.constant dense<0.000000e+00> : vector<8x8xf32>
    %101 = tpu.matmul %98, %99, %cst_27 {dimension_numbers = #tpu.dot_dimension_numbers<[1], [1], [0], [0], [0, 0, 1, 0], [], []>} : vector<8x8xf32>, vector<8x8xf32>, vector<8x8xf32> -> vector<8x8xf32>
    %cst_28 = arith.constant -1.000000e+30 : f32
    %102 = vector.broadcast %cst_28 : f32 to vector<8x8xf32>
    %103 = arith.select %35, %101, %102 : vector<8x8xi1>, vector<8x8xf32>
    %cst_29 = arith.constant dense<0xFF800000> : vector<8xf32>
    %104 = vector.multi_reduction <maximumf>, %103, %cst_29 [1] : vector<8x8xf32> to vector<8xf32>
    %105 = vector.shape_cast %104 : vector<8xf32> to vector<8x1xf32>
    %106 = vector.broadcast %105 : vector<8x1xf32> to vector<8x8xf32>
    %107 = arith.subf %103, %106 : vector<8x8xf32>
    %108 = math.exp %107 : vector<8x8xf32>
    %cst_30 = arith.constant dense<0.000000e+00> : vector<8xf32>
    %109 = vector.multi_reduction <add>, %108, %cst_30 [1] : vector<8x8xf32> to vector<8xf32>
    %110 = vector.shape_cast %109 : vector<8xf32> to vector<8x1xf32>
    %111 = tpu.reciprocal %110 {approx = true} : vector<8x1xf32> -> vector<8x1xf32>
    %112 = vector.broadcast %111 : vector<8x1xf32> to vector<8x8xf32>
    %113 = arith.mulf %108, %112 : vector<8x8xf32>
    %cst_31 = arith.constant dense<0.000000e+00> : vector<8x8xf32>
    %114 = tpu.matmul %113, %100, %cst_31 {dimension_numbers = #tpu.dot_dimension_numbers<[1], [0], [0], [1], [0, 0, 1, 1], [], []>} : vector<8x8xf32>, vector<8x8xf32>, vector<8x8xf32> -> vector<8x8xf32>
    %115 = tpu.concatenate %57, %76, %95, %114 in 1 : vector<8x8xf32>, vector<8x8xf32>, vector<8x8xf32>, vector<8x8xf32> -> vector<8x32xf32>
    %c0_32 = arith.constant 0 : index
    %c0_33 = arith.constant 0 : index
    %c0_34 = arith.constant 0 : index
    %116 = vector.load %arg5[%c0_32, %c0_33, %c0_34] : memref<2x32x32xf32, #tpu.memory_space<vmem>>, vector<1x32x32xf32>
    %117 = vector.shape_cast %116 : vector<1x32x32xf32> to vector<32x32xf32>
    %cst_35 = arith.constant dense<0.000000e+00> : vector<8x32xf32>
    %118 = tpu.matmul %115, %117, %cst_35 {dimension_numbers = #tpu.dot_dimension_numbers<[1], [1], [0], [0], [0, 0, 1, 0], [], []>} : vector<8x32xf32>, vector<32x32xf32>, vector<8x32xf32> -> vector<8x32xf32>
    %119 = arith.addf %32, %118 : vector<8x32xf32>
    %c0_36 = arith.constant 0 : index
    %c0_37 = arith.constant 0 : index
    %c0_38 = arith.constant 0 : index
    %120 = vector.load %arg6[%c0_36, %c0_37, %c0_38] : memref<2x1x32xf32, #tpu.memory_space<vmem>>, vector<1x1x32xf32>
    %121 = vector.shape_cast %120 : vector<1x1x32xf32> to vector<1x32xf32>
    %c0_39 = arith.constant 0 : index
    %c0_40 = arith.constant 0 : index
    %c0_41 = arith.constant 0 : index
    %122 = vector.load %arg7[%c0_39, %c0_40, %c0_41] : memref<2x1x32xf32, #tpu.memory_space<vmem>>, vector<1x1x32xf32>
    %123 = vector.shape_cast %122 : vector<1x1x32xf32> to vector<1x32xf32>
    %cst_42 = arith.constant dense<0.000000e+00> : vector<8xf32>
    %124 = vector.multi_reduction <add>, %119, %cst_42 [1] : vector<8x32xf32> to vector<8xf32>
    %125 = vector.shape_cast %124 : vector<8xf32> to vector<8x1xf32>
    %cst_43 = arith.constant 3.200000e+01 : f32
    %126 = vector.broadcast %cst_43 : f32 to vector<8x1xf32>
    %127 = arith.divf %125, %126 : vector<8x1xf32>
    %128 = vector.broadcast %127 : vector<8x1xf32> to vector<8x32xf32>
    %129 = arith.subf %119, %128 : vector<8x32xf32>
    %130 = arith.mulf %129, %129 : vector<8x32xf32>
    %cst_44 = arith.constant dense<0.000000e+00> : vector<8xf32>
    %131 = vector.multi_reduction <add>, %130, %cst_44 [1] : vector<8x32xf32> to vector<8xf32>
    %132 = vector.shape_cast %131 : vector<8xf32> to vector<8x1xf32>
    %cst_45 = arith.constant 3.200000e+01 : f32
    %133 = vector.broadcast %cst_45 : f32 to vector<8x1xf32>
    %134 = arith.divf %132, %133 : vector<8x1xf32>
    %cst_46 = arith.constant 9.99999974E-6 : f32
    %135 = vector.broadcast %cst_46 : f32 to vector<8x1xf32>
    %136 = arith.addf %134, %135 : vector<8x1xf32>
    %137 = math.rsqrt %136 : vector<8x1xf32>
    %138 = vector.broadcast %137 : vector<8x1xf32> to vector<8x32xf32>
    %139 = arith.mulf %129, %138 : vector<8x32xf32>
    %140 = vector.broadcast %121 : vector<1x32xf32> to vector<8x32xf32>
    %141 = arith.mulf %139, %140 : vector<8x32xf32>
    %142 = vector.broadcast %123 : vector<1x32xf32> to vector<8x32xf32>
    %143 = arith.addf %141, %142 : vector<8x32xf32>
    %c0_47 = arith.constant 0 : index
    %c0_48 = arith.constant 0 : index
    %c0_49 = arith.constant 0 : index
    %144 = vector.load %arg8[%c0_47, %c0_48, %c0_49] : memref<2x128x32xf32, #tpu.memory_space<vmem>>, vector<1x128x32xf32>
    %145 = vector.shape_cast %144 : vector<1x128x32xf32> to vector<128x32xf32>
    %cst_50 = arith.constant dense<0.000000e+00> : vector<8x128xf32>
    %146 = tpu.matmul %143, %145, %cst_50 {dimension_numbers = #tpu.dot_dimension_numbers<[1], [1], [0], [0], [0, 0, 1, 0], [], []>} : vector<8x32xf32>, vector<128x32xf32>, vector<8x128xf32> -> vector<8x128xf32>
    %c0_51 = arith.constant 0 : index
    %c0_52 = arith.constant 0 : index
    %c0_53 = arith.constant 0 : index
    %147 = vector.load %arg9[%c0_51, %c0_52, %c0_53] : memref<2x1x128xf32, #tpu.memory_space<vmem>>, vector<1x1x128xf32>
    %148 = vector.shape_cast %147 : vector<1x1x128xf32> to vector<1x128xf32>
    %149 = vector.broadcast %148 : vector<1x128xf32> to vector<8x128xf32>
    %150 = arith.addf %146, %149 : vector<8x128xf32>
    %cst_54 = arith.constant 0.000000e+00 : f32
    %151 = vector.broadcast %cst_54 : f32 to vector<8x128xf32>
    %152 = arith.maximumf %150, %151 : vector<8x128xf32>
    %c0_55 = arith.constant 0 : index
    %c0_56 = arith.constant 0 : index
    %c0_57 = arith.constant 0 : index
    %153 = vector.load %arg10[%c0_55, %c0_56, %c0_57] : memref<2x32x128xf32, #tpu.memory_space<vmem>>, vector<1x32x128xf32>
    %154 = vector.shape_cast %153 : vector<1x32x128xf32> to vector<32x128xf32>
    %cst_58 = arith.constant dense<0.000000e+00> : vector<8x32xf32>
    %155 = tpu.matmul %152, %154, %cst_58 {dimension_numbers = #tpu.dot_dimension_numbers<[1], [1], [0], [0], [0, 0, 1, 0], [], []>} : vector<8x128xf32>, vector<32x128xf32>, vector<8x32xf32> -> vector<8x32xf32>
    %c0_59 = arith.constant 0 : index
    %c0_60 = arith.constant 0 : index
    %c0_61 = arith.constant 0 : index
    %156 = vector.load %arg11[%c0_59, %c0_60, %c0_61] : memref<2x1x32xf32, #tpu.memory_space<vmem>>, vector<1x1x32xf32>
    %157 = vector.shape_cast %156 : vector<1x1x32xf32> to vector<1x32xf32>
    %158 = vector.broadcast %157 : vector<1x32xf32> to vector<8x32xf32>
    %159 = arith.addf %155, %158 : vector<8x32xf32>
    %160 = arith.addf %159, %32 : vector<8x32xf32>
    %c0_62 = arith.constant 0 : index
    %c0_63 = arith.constant 0 : index
    %c0_64 = arith.constant 0 : index
    %161 = vector.load %arg12[%c0_62, %c0_63, %c0_64] : memref<2x1x32xf32, #tpu.memory_space<vmem>>, vector<1x1x32xf32>
    %162 = vector.shape_cast %161 : vector<1x1x32xf32> to vector<1x32xf32>
    %c0_65 = arith.constant 0 : index
    %c0_66 = arith.constant 0 : index
    %c0_67 = arith.constant 0 : index
    %163 = vector.load %arg13[%c0_65, %c0_66, %c0_67] : memref<2x1x32xf32, #tpu.memory_space<vmem>>, vector<1x1x32xf32>
    %164 = vector.shape_cast %163 : vector<1x1x32xf32> to vector<1x32xf32>
    %cst_68 = arith.constant dense<0.000000e+00> : vector<8xf32>
    %165 = vector.multi_reduction <add>, %160, %cst_68 [1] : vector<8x32xf32> to vector<8xf32>
    %166 = vector.shape_cast %165 : vector<8xf32> to vector<8x1xf32>
    %cst_69 = arith.constant 3.200000e+01 : f32
    %167 = vector.broadcast %cst_69 : f32 to vector<8x1xf32>
    %168 = arith.divf %166, %167 : vector<8x1xf32>
    %169 = vector.broadcast %168 : vector<8x1xf32> to vector<8x32xf32>
    %170 = arith.subf %160, %169 : vector<8x32xf32>
    %171 = arith.mulf %170, %170 : vector<8x32xf32>
    %cst_70 = arith.constant dense<0.000000e+00> : vector<8xf32>
    %172 = vector.multi_reduction <add>, %171, %cst_70 [1] : vector<8x32xf32> to vector<8xf32>
    %173 = vector.shape_cast %172 : vector<8xf32> to vector<8x1xf32>
    %cst_71 = arith.constant 3.200000e+01 : f32
    %174 = vector.broadcast %cst_71 : f32 to vector<8x1xf32>
    %175 = arith.divf %173, %174 : vector<8x1xf32>
    %cst_72 = arith.constant 9.99999974E-6 : f32
    %176 = vector.broadcast %cst_72 : f32 to vector<8x1xf32>
    %177 = arith.addf %175, %176 : vector<8x1xf32>
    %178 = math.rsqrt %177 : vector<8x1xf32>
    %179 = vector.broadcast %178 : vector<8x1xf32> to vector<8x32xf32>
    %180 = arith.mulf %170, %179 : vector<8x32xf32>
    %181 = vector.broadcast %162 : vector<1x32xf32> to vector<8x32xf32>
    %182 = arith.mulf %180, %181 : vector<8x32xf32>
    %183 = vector.broadcast %164 : vector<1x32xf32> to vector<8x32xf32>
    %184 = arith.addf %182, %183 : vector<8x32xf32>
    %c1_73 = arith.constant 1 : index
    %c0_74 = arith.constant 0 : index
    %c0_75 = arith.constant 0 : index
    %185 = vector.load %arg4[%c1_73, %c0_74, %c0_75] : memref<2x96x32xf32, #tpu.memory_space<vmem>>, vector<1x96x32xf32>
    %186 = vector.shape_cast %185 : vector<1x96x32xf32> to vector<96x32xf32>
    %cst_76 = arith.constant dense<0.000000e+00> : vector<8x96xf32>
    %187 = tpu.matmul %184, %186, %cst_76 {dimension_numbers = #tpu.dot_dimension_numbers<[1], [1], [0], [0], [0, 0, 1, 0], [], []>} : vector<8x32xf32>, vector<96x32xf32>, vector<8x96xf32> -> vector<8x96xf32>
    %188 = vector.extract_strided_slice %187 {offsets = [0, 0], sizes = [8, 8], strides = [1, 1]} : vector<8x96xf32> to vector<8x8xf32>
    %cst_77 = arith.constant 0.353553385 : f32
    %189 = vector.broadcast %cst_77 : f32 to vector<8x8xf32>
    %190 = arith.mulf %188, %189 : vector<8x8xf32>
    %191 = vector.extract_strided_slice %187 {offsets = [0, 32], sizes = [8, 8], strides = [1, 1]} : vector<8x96xf32> to vector<8x8xf32>
    %192 = vector.extract_strided_slice %187 {offsets = [0, 64], sizes = [8, 8], strides = [1, 1]} : vector<8x96xf32> to vector<8x8xf32>
    %cst_78 = arith.constant dense<0.000000e+00> : vector<8x8xf32>
    %193 = tpu.matmul %190, %191, %cst_78 {dimension_numbers = #tpu.dot_dimension_numbers<[1], [1], [0], [0], [0, 0, 1, 0], [], []>} : vector<8x8xf32>, vector<8x8xf32>, vector<8x8xf32> -> vector<8x8xf32>
    %cst_79 = arith.constant -1.000000e+30 : f32
    %194 = vector.broadcast %cst_79 : f32 to vector<8x8xf32>
    %195 = arith.select %35, %193, %194 : vector<8x8xi1>, vector<8x8xf32>
    %cst_80 = arith.constant dense<0xFF800000> : vector<8xf32>
    %196 = vector.multi_reduction <maximumf>, %195, %cst_80 [1] : vector<8x8xf32> to vector<8xf32>
    %197 = vector.shape_cast %196 : vector<8xf32> to vector<8x1xf32>
    %198 = vector.broadcast %197 : vector<8x1xf32> to vector<8x8xf32>
    %199 = arith.subf %195, %198 : vector<8x8xf32>
    %200 = math.exp %199 : vector<8x8xf32>
    %cst_81 = arith.constant dense<0.000000e+00> : vector<8xf32>
    %201 = vector.multi_reduction <add>, %200, %cst_81 [1] : vector<8x8xf32> to vector<8xf32>
    %202 = vector.shape_cast %201 : vector<8xf32> to vector<8x1xf32>
    %203 = tpu.reciprocal %202 {approx = true} : vector<8x1xf32> -> vector<8x1xf32>
    %204 = vector.broadcast %203 : vector<8x1xf32> to vector<8x8xf32>
    %205 = arith.mulf %200, %204 : vector<8x8xf32>
    %cst_82 = arith.constant dense<0.000000e+00> : vector<8x8xf32>
    %206 = tpu.matmul %205, %192, %cst_82 {dimension_numbers = #tpu.dot_dimension_numbers<[1], [0], [0], [1], [0, 0, 1, 1], [], []>} : vector<8x8xf32>, vector<8x8xf32>, vector<8x8xf32> -> vector<8x8xf32>
    %207 = vector.extract_strided_slice %187 {offsets = [0, 8], sizes = [8, 8], strides = [1, 1]} : vector<8x96xf32> to vector<8x8xf32>
    %cst_83 = arith.constant 0.353553385 : f32
    %208 = vector.broadcast %cst_83 : f32 to vector<8x8xf32>
    %209 = arith.mulf %207, %208 : vector<8x8xf32>
    %210 = vector.extract_strided_slice %187 {offsets = [0, 40], sizes = [8, 8], strides = [1, 1]} : vector<8x96xf32> to vector<8x8xf32>
    %211 = vector.extract_strided_slice %187 {offsets = [0, 72], sizes = [8, 8], strides = [1, 1]} : vector<8x96xf32> to vector<8x8xf32>
    %cst_84 = arith.constant dense<0.000000e+00> : vector<8x8xf32>
    %212 = tpu.matmul %209, %210, %cst_84 {dimension_numbers = #tpu.dot_dimension_numbers<[1], [1], [0], [0], [0, 0, 1, 0], [], []>} : vector<8x8xf32>, vector<8x8xf32>, vector<8x8xf32> -> vector<8x8xf32>
    %cst_85 = arith.constant -1.000000e+30 : f32
    %213 = vector.broadcast %cst_85 : f32 to vector<8x8xf32>
    %214 = arith.select %35, %212, %213 : vector<8x8xi1>, vector<8x8xf32>
    %cst_86 = arith.constant dense<0xFF800000> : vector<8xf32>
    %215 = vector.multi_reduction <maximumf>, %214, %cst_86 [1] : vector<8x8xf32> to vector<8xf32>
    %216 = vector.shape_cast %215 : vector<8xf32> to vector<8x1xf32>
    %217 = vector.broadcast %216 : vector<8x1xf32> to vector<8x8xf32>
    %218 = arith.subf %214, %217 : vector<8x8xf32>
    %219 = math.exp %218 : vector<8x8xf32>
    %cst_87 = arith.constant dense<0.000000e+00> : vector<8xf32>
    %220 = vector.multi_reduction <add>, %219, %cst_87 [1] : vector<8x8xf32> to vector<8xf32>
    %221 = vector.shape_cast %220 : vector<8xf32> to vector<8x1xf32>
    %222 = tpu.reciprocal %221 {approx = true} : vector<8x1xf32> -> vector<8x1xf32>
    %223 = vector.broadcast %222 : vector<8x1xf32> to vector<8x8xf32>
    %224 = arith.mulf %219, %223 : vector<8x8xf32>
    %cst_88 = arith.constant dense<0.000000e+00> : vector<8x8xf32>
    %225 = tpu.matmul %224, %211, %cst_88 {dimension_numbers = #tpu.dot_dimension_numbers<[1], [0], [0], [1], [0, 0, 1, 1], [], []>} : vector<8x8xf32>, vector<8x8xf32>, vector<8x8xf32> -> vector<8x8xf32>
    %226 = vector.extract_strided_slice %187 {offsets = [0, 16], sizes = [8, 8], strides = [1, 1]} : vector<8x96xf32> to vector<8x8xf32>
    %cst_89 = arith.constant 0.353553385 : f32
    %227 = vector.broadcast %cst_89 : f32 to vector<8x8xf32>
    %228 = arith.mulf %226, %227 : vector<8x8xf32>
    %229 = vector.extract_strided_slice %187 {offsets = [0, 48], sizes = [8, 8], strides = [1, 1]} : vector<8x96xf32> to vector<8x8xf32>
    %230 = vector.extract_strided_slice %187 {offsets = [0, 80], sizes = [8, 8], strides = [1, 1]} : vector<8x96xf32> to vector<8x8xf32>
    %cst_90 = arith.constant dense<0.000000e+00> : vector<8x8xf32>
    %231 = tpu.matmul %228, %229, %cst_90 {dimension_numbers = #tpu.dot_dimension_numbers<[1], [1], [0], [0], [0, 0, 1, 0], [], []>} : vector<8x8xf32>, vector<8x8xf32>, vector<8x8xf32> -> vector<8x8xf32>
    %cst_91 = arith.constant -1.000000e+30 : f32
    %232 = vector.broadcast %cst_91 : f32 to vector<8x8xf32>
    %233 = arith.select %35, %231, %232 : vector<8x8xi1>, vector<8x8xf32>
    %cst_92 = arith.constant dense<0xFF800000> : vector<8xf32>
    %234 = vector.multi_reduction <maximumf>, %233, %cst_92 [1] : vector<8x8xf32> to vector<8xf32>
    %235 = vector.shape_cast %234 : vector<8xf32> to vector<8x1xf32>
    %236 = vector.broadcast %235 : vector<8x1xf32> to vector<8x8xf32>
    %237 = arith.subf %233, %236 : vector<8x8xf32>
    %238 = math.exp %237 : vector<8x8xf32>
    %cst_93 = arith.constant dense<0.000000e+00> : vector<8xf32>
    %239 = vector.multi_reduction <add>, %238, %cst_93 [1] : vector<8x8xf32> to vector<8xf32>
    %240 = vector.shape_cast %239 : vector<8xf32> to vector<8x1xf32>
    %241 = tpu.reciprocal %240 {approx = true} : vector<8x1xf32> -> vector<8x1xf32>
    %242 = vector.broadcast %241 : vector<8x1xf32> to vector<8x8xf32>
    %243 = arith.mulf %238, %242 : vector<8x8xf32>
    %cst_94 = arith.constant dense<0.000000e+00> : vector<8x8xf32>
    %244 = tpu.matmul %243, %230, %cst_94 {dimension_numbers = #tpu.dot_dimension_numbers<[1], [0], [0], [1], [0, 0, 1, 1], [], []>} : vector<8x8xf32>, vector<8x8xf32>, vector<8x8xf32> -> vector<8x8xf32>
    %245 = vector.extract_strided_slice %187 {offsets = [0, 24], sizes = [8, 8], strides = [1, 1]} : vector<8x96xf32> to vector<8x8xf32>
    %cst_95 = arith.constant 0.353553385 : f32
    %246 = vector.broadcast %cst_95 : f32 to vector<8x8xf32>
    %247 = arith.mulf %245, %246 : vector<8x8xf32>
    %248 = vector.extract_strided_slice %187 {offsets = [0, 56], sizes = [8, 8], strides = [1, 1]} : vector<8x96xf32> to vector<8x8xf32>
    %249 = vector.extract_strided_slice %187 {offsets = [0, 88], sizes = [8, 8], strides = [1, 1]} : vector<8x96xf32> to vector<8x8xf32>
    %cst_96 = arith.constant dense<0.000000e+00> : vector<8x8xf32>
    %250 = tpu.matmul %247, %248, %cst_96 {dimension_numbers = #tpu.dot_dimension_numbers<[1], [1], [0], [0], [0, 0, 1, 0], [], []>} : vector<8x8xf32>, vector<8x8xf32>, vector<8x8xf32> -> vector<8x8xf32>
    %cst_97 = arith.constant -1.000000e+30 : f32
    %251 = vector.broadcast %cst_97 : f32 to vector<8x8xf32>
    %252 = arith.select %35, %250, %251 : vector<8x8xi1>, vector<8x8xf32>
    %cst_98 = arith.constant dense<0xFF800000> : vector<8xf32>
    %253 = vector.multi_reduction <maximumf>, %252, %cst_98 [1] : vector<8x8xf32> to vector<8xf32>
    %254 = vector.shape_cast %253 : vector<8xf32> to vector<8x1xf32>
    %255 = vector.broadcast %254 : vector<8x1xf32> to vector<8x8xf32>
    %256 = arith.subf %252, %255 : vector<8x8xf32>
    %257 = math.exp %256 : vector<8x8xf32>
    %cst_99 = arith.constant dense<0.000000e+00> : vector<8xf32>
    %258 = vector.multi_reduction <add>, %257, %cst_99 [1] : vector<8x8xf32> to vector<8xf32>
    %259 = vector.shape_cast %258 : vector<8xf32> to vector<8x1xf32>
    %260 = tpu.reciprocal %259 {approx = true} : vector<8x1xf32> -> vector<8x1xf32>
    %261 = vector.broadcast %260 : vector<8x1xf32> to vector<8x8xf32>
    %262 = arith.mulf %257, %261 : vector<8x8xf32>
    %cst_100 = arith.constant dense<0.000000e+00> : vector<8x8xf32>
    %263 = tpu.matmul %262, %249, %cst_100 {dimension_numbers = #tpu.dot_dimension_numbers<[1], [0], [0], [1], [0, 0, 1, 1], [], []>} : vector<8x8xf32>, vector<8x8xf32>, vector<8x8xf32> -> vector<8x8xf32>
    %264 = tpu.concatenate %206, %225, %244, %263 in 1 : vector<8x8xf32>, vector<8x8xf32>, vector<8x8xf32>, vector<8x8xf32> -> vector<8x32xf32>
    %c1_101 = arith.constant 1 : index
    %c0_102 = arith.constant 0 : index
    %c0_103 = arith.constant 0 : index
    %265 = vector.load %arg5[%c1_101, %c0_102, %c0_103] : memref<2x32x32xf32, #tpu.memory_space<vmem>>, vector<1x32x32xf32>
    %266 = vector.shape_cast %265 : vector<1x32x32xf32> to vector<32x32xf32>
    %cst_104 = arith.constant dense<0.000000e+00> : vector<8x32xf32>
    %267 = tpu.matmul %264, %266, %cst_104 {dimension_numbers = #tpu.dot_dimension_numbers<[1], [1], [0], [0], [0, 0, 1, 0], [], []>} : vector<8x32xf32>, vector<32x32xf32>, vector<8x32xf32> -> vector<8x32xf32>
    %268 = arith.addf %184, %267 : vector<8x32xf32>
    %c1_105 = arith.constant 1 : index
    %c0_106 = arith.constant 0 : index
    %c0_107 = arith.constant 0 : index
    %269 = vector.load %arg6[%c1_105, %c0_106, %c0_107] : memref<2x1x32xf32, #tpu.memory_space<vmem>>, vector<1x1x32xf32>
    %270 = vector.shape_cast %269 : vector<1x1x32xf32> to vector<1x32xf32>
    %c1_108 = arith.constant 1 : index
    %c0_109 = arith.constant 0 : index
    %c0_110 = arith.constant 0 : index
    %271 = vector.load %arg7[%c1_108, %c0_109, %c0_110] : memref<2x1x32xf32, #tpu.memory_space<vmem>>, vector<1x1x32xf32>
    %272 = vector.shape_cast %271 : vector<1x1x32xf32> to vector<1x32xf32>
    %cst_111 = arith.constant dense<0.000000e+00> : vector<8xf32>
    %273 = vector.multi_reduction <add>, %268, %cst_111 [1] : vector<8x32xf32> to vector<8xf32>
    %274 = vector.shape_cast %273 : vector<8xf32> to vector<8x1xf32>
    %cst_112 = arith.constant 3.200000e+01 : f32
    %275 = vector.broadcast %cst_112 : f32 to vector<8x1xf32>
    %276 = arith.divf %274, %275 : vector<8x1xf32>
    %277 = vector.broadcast %276 : vector<8x1xf32> to vector<8x32xf32>
    %278 = arith.subf %268, %277 : vector<8x32xf32>
    %279 = arith.mulf %278, %278 : vector<8x32xf32>
    %cst_113 = arith.constant dense<0.000000e+00> : vector<8xf32>
    %280 = vector.multi_reduction <add>, %279, %cst_113 [1] : vector<8x32xf32> to vector<8xf32>
    %281 = vector.shape_cast %280 : vector<8xf32> to vector<8x1xf32>
    %cst_114 = arith.constant 3.200000e+01 : f32
    %282 = vector.broadcast %cst_114 : f32 to vector<8x1xf32>
    %283 = arith.divf %281, %282 : vector<8x1xf32>
    %cst_115 = arith.constant 9.99999974E-6 : f32
    %284 = vector.broadcast %cst_115 : f32 to vector<8x1xf32>
    %285 = arith.addf %283, %284 : vector<8x1xf32>
    %286 = math.rsqrt %285 : vector<8x1xf32>
    %287 = vector.broadcast %286 : vector<8x1xf32> to vector<8x32xf32>
    %288 = arith.mulf %278, %287 : vector<8x32xf32>
    %289 = vector.broadcast %270 : vector<1x32xf32> to vector<8x32xf32>
    %290 = arith.mulf %288, %289 : vector<8x32xf32>
    %291 = vector.broadcast %272 : vector<1x32xf32> to vector<8x32xf32>
    %292 = arith.addf %290, %291 : vector<8x32xf32>
    %c1_116 = arith.constant 1 : index
    %c0_117 = arith.constant 0 : index
    %c0_118 = arith.constant 0 : index
    %293 = vector.load %arg8[%c1_116, %c0_117, %c0_118] : memref<2x128x32xf32, #tpu.memory_space<vmem>>, vector<1x128x32xf32>
    %294 = vector.shape_cast %293 : vector<1x128x32xf32> to vector<128x32xf32>
    %cst_119 = arith.constant dense<0.000000e+00> : vector<8x128xf32>
    %295 = tpu.matmul %292, %294, %cst_119 {dimension_numbers = #tpu.dot_dimension_numbers<[1], [1], [0], [0], [0, 0, 1, 0], [], []>} : vector<8x32xf32>, vector<128x32xf32>, vector<8x128xf32> -> vector<8x128xf32>
    %c1_120 = arith.constant 1 : index
    %c0_121 = arith.constant 0 : index
    %c0_122 = arith.constant 0 : index
    %296 = vector.load %arg9[%c1_120, %c0_121, %c0_122] : memref<2x1x128xf32, #tpu.memory_space<vmem>>, vector<1x1x128xf32>
    %297 = vector.shape_cast %296 : vector<1x1x128xf32> to vector<1x128xf32>
    %298 = vector.broadcast %297 : vector<1x128xf32> to vector<8x128xf32>
    %299 = arith.addf %295, %298 : vector<8x128xf32>
    %cst_123 = arith.constant 0.000000e+00 : f32
    %300 = vector.broadcast %cst_123 : f32 to vector<8x128xf32>
    %301 = arith.maximumf %299, %300 : vector<8x128xf32>
    %c1_124 = arith.constant 1 : index
    %c0_125 = arith.constant 0 : index
    %c0_126 = arith.constant 0 : index
    %302 = vector.load %arg10[%c1_124, %c0_125, %c0_126] : memref<2x32x128xf32, #tpu.memory_space<vmem>>, vector<1x32x128xf32>
    %303 = vector.shape_cast %302 : vector<1x32x128xf32> to vector<32x128xf32>
    %cst_127 = arith.constant dense<0.000000e+00> : vector<8x32xf32>
    %304 = tpu.matmul %301, %303, %cst_127 {dimension_numbers = #tpu.dot_dimension_numbers<[1], [1], [0], [0], [0, 0, 1, 0], [], []>} : vector<8x128xf32>, vector<32x128xf32>, vector<8x32xf32> -> vector<8x32xf32>
    %c1_128 = arith.constant 1 : index
    %c0_129 = arith.constant 0 : index
    %c0_130 = arith.constant 0 : index
    %305 = vector.load %arg11[%c1_128, %c0_129, %c0_130] : memref<2x1x32xf32, #tpu.memory_space<vmem>>, vector<1x1x32xf32>
    %306 = vector.shape_cast %305 : vector<1x1x32xf32> to vector<1x32xf32>
    %307 = vector.broadcast %306 : vector<1x32xf32> to vector<8x32xf32>
    %308 = arith.addf %304, %307 : vector<8x32xf32>
    %309 = arith.addf %308, %184 : vector<8x32xf32>
    %c1_131 = arith.constant 1 : index
    %c0_132 = arith.constant 0 : index
    %c0_133 = arith.constant 0 : index
    %310 = vector.load %arg12[%c1_131, %c0_132, %c0_133] : memref<2x1x32xf32, #tpu.memory_space<vmem>>, vector<1x1x32xf32>
    %311 = vector.shape_cast %310 : vector<1x1x32xf32> to vector<1x32xf32>
    %c1_134 = arith.constant 1 : index
    %c0_135 = arith.constant 0 : index
    %c0_136 = arith.constant 0 : index
    %312 = vector.load %arg13[%c1_134, %c0_135, %c0_136] : memref<2x1x32xf32, #tpu.memory_space<vmem>>, vector<1x1x32xf32>
    %313 = vector.shape_cast %312 : vector<1x1x32xf32> to vector<1x32xf32>
    %cst_137 = arith.constant dense<0.000000e+00> : vector<8xf32>
    %314 = vector.multi_reduction <add>, %309, %cst_137 [1] : vector<8x32xf32> to vector<8xf32>
    %315 = vector.shape_cast %314 : vector<8xf32> to vector<8x1xf32>
    %cst_138 = arith.constant 3.200000e+01 : f32
    %316 = vector.broadcast %cst_138 : f32 to vector<8x1xf32>
    %317 = arith.divf %315, %316 : vector<8x1xf32>
    %318 = vector.broadcast %317 : vector<8x1xf32> to vector<8x32xf32>
    %319 = arith.subf %309, %318 : vector<8x32xf32>
    %320 = arith.mulf %319, %319 : vector<8x32xf32>
    %cst_139 = arith.constant dense<0.000000e+00> : vector<8xf32>
    %321 = vector.multi_reduction <add>, %320, %cst_139 [1] : vector<8x32xf32> to vector<8xf32>
    %322 = vector.shape_cast %321 : vector<8xf32> to vector<8x1xf32>
    %cst_140 = arith.constant 3.200000e+01 : f32
    %323 = vector.broadcast %cst_140 : f32 to vector<8x1xf32>
    %324 = arith.divf %322, %323 : vector<8x1xf32>
    %cst_141 = arith.constant 9.99999974E-6 : f32
    %325 = vector.broadcast %cst_141 : f32 to vector<8x1xf32>
    %326 = arith.addf %324, %325 : vector<8x1xf32>
    %327 = math.rsqrt %326 : vector<8x1xf32>
    %328 = vector.broadcast %327 : vector<8x1xf32> to vector<8x32xf32>
    %329 = arith.mulf %319, %328 : vector<8x32xf32>
    %330 = vector.broadcast %311 : vector<1x32xf32> to vector<8x32xf32>
    %331 = arith.mulf %329, %330 : vector<8x32xf32>
    %332 = vector.broadcast %313 : vector<1x32xf32> to vector<8x32xf32>
    %333 = arith.addf %331, %332 : vector<8x32xf32>
    %c0_142 = arith.constant 0 : index
    %c0_143 = arith.constant 0 : index
    %334 = vector.load %arg14[%c0_142, %c0_143] : memref<64x32xf32, #tpu.memory_space<vmem>>, vector<64x32xf32>
    %cst_144 = arith.constant dense<0.000000e+00> : vector<8x64xf32>
    %335 = tpu.matmul %333, %334, %cst_144 {dimension_numbers = #tpu.dot_dimension_numbers<[1], [1], [0], [0], [0, 0, 1, 0], [], []>} : vector<8x32xf32>, vector<64x32xf32>, vector<8x64xf32> -> vector<8x64xf32>
    %c0_145 = arith.constant 0 : index
    %c0_146 = arith.constant 0 : index
    %336 = vector.load %arg15[%c0_145, %c0_146] : memref<1x64xf32, #tpu.memory_space<vmem>>, vector<1x64xf32>
    %337 = vector.broadcast %336 : vector<1x64xf32> to vector<8x64xf32>
    %338 = arith.addf %335, %337 : vector<8x64xf32>
    %c0_147 = arith.constant 0 : index
    %c0_148 = arith.constant 0 : index
    %c0_149 = arith.constant 0 : index
    %339 = vector.load %arg16[%c0_147, %c0_148, %c0_149] : memref<1x8x64xf32, #tpu.memory_space<vmem>>, vector<1x8x64xf32>
    %340 = vector.shape_cast %339 : vector<1x8x64xf32> to vector<8x64xf32>
    %341 = vector.shape_cast %338 : vector<8x64xf32> to vector<1x8x64xf32>
    tpu.vector_store %arg16[%c0_147, %c0_148, %c0_149], %341 {strides = array<i32>} : memref<1x8x64xf32, #tpu.memory_space<vmem>>, vector<1x8x64xf32>,
    return
  }
  func.func @transform_0(%arg0: i32, %arg1: memref<2x8xi32, #tpu.memory_space<smem>>) -> (i32, i32) {
    %c0_i32 = arith.constant 0 : i32
    %c0_i32_0 = arith.constant 0 : i32
    %c0_i32_1 = arith.constant 0 : i32
    return %c0_i32, %c0_i32_0 : i32, i32
  }
  func.func @transform_1(%arg0: i32, %arg1: memref<2x8xi32, #tpu.memory_space<smem>>) -> (i32, i32) {
    %c0_i32 = arith.constant 0 : i32
    %c0_i32_0 = arith.constant 0 : i32
    %c0_i32_1 = arith.constant 0 : i32
    return %c0_i32, %c0_i32_0 : i32, i32
  }
  func.func @transform_2(%arg0: i32, %arg1: memref<2x8xi32, #tpu.memory_space<smem>>) -> (i32, i32, i32) {
    %c0_i32 = arith.constant 0 : i32
    %c0_i32_0 = arith.constant 0 : i32
    %c0_i32_1 = arith.constant 0 : i32
    %c0_i32_2 = arith.constant 0 : i32
    return %c0_i32, %c0_i32_0, %c0_i32_1 : i32, i32, i32
  }
  func.func @transform_3(%arg0: i32, %arg1: memref<2x8xi32, #tpu.memory_space<smem>>) -> (i32, i32, i32) {
    %c0_i32 = arith.constant 0 : i32
    %c0_i32_0 = arith.constant 0 : i32
    %c0_i32_1 = arith.constant 0 : i32
    %c0_i32_2 = arith.constant 0 : i32
    return %c0_i32, %c0_i32_0, %c0_i32_1 : i32, i32, i32
  }
  func.func @transform_4(%arg0: i32, %arg1: memref<2x8xi32, #tpu.memory_space<smem>>) -> (i32, i32, i32) {
    %c0_i32 = arith.constant 0 : i32
    %c0_i32_0 = arith.constant 0 : i32
    %c0_i32_1 = arith.constant 0 : i32
    %c0_i32_2 = arith.constant 0 : i32
    return %c0_i32, %c0_i32_0, %c0_i32_1 : i32, i32, i32
  }
  func.func @transform_5(%arg0: i32, %arg1: memref<2x8xi32, #tpu.memory_space<smem>>) -> (i32, i32, i32) {
    %c0_i32 = arith.constant 0 : i32
    %c0_i32_0 = arith.constant 0 : i32
    %c0_i32_1 = arith.constant 0 : i32
    %c0_i32_2 = arith.constant 0 : i32
    return %c0_i32, %c0_i32_0, %c0_i32_1 : i32, i32, i32
  }
  func.func @transform_6(%arg0: i32, %arg1: memref<2x8xi32, #tpu.memory_space<smem>>) -> (i32, i32, i32) {
    %c0_i32 = arith.constant 0 : i32
    %c0_i32_0 = arith.constant 0 : i32
    %c0_i32_1 = arith.constant 0 : i32
    %c0_i32_2 = arith.constant 0 : i32
    return %c0_i32, %c0_i32_0, %c0_i32_1 : i32, i32, i32
  }
  func.func @transform_7(%arg0: i32, %arg1: memref<2x8xi32, #tpu.memory_space<smem>>) -> (i32, i32, i32) {
    %c0_i32 = arith.constant 0 : i32
    %c0_i32_0 = arith.constant 0 : i32
    %c0_i32_1 = arith.constant 0 : i32
    %c0_i32_2 = arith.constant 0 : i32
    return %c0_i32, %c0_i32_0, %c0_i32_1 : i32, i32, i32
  }
  func.func @transform_8(%arg0: i32, %arg1: memref<2x8xi32, #tpu.memory_space<smem>>) -> (i32, i32, i32) {
    %c0_i32 = arith.constant 0 : i32
    %c0_i32_0 = arith.constant 0 : i32
    %c0_i32_1 = arith.constant 0 : i32
    %c0_i32_2 = arith.constant 0 : i32
    return %c0_i32, %c0_i32_0, %c0_i32_1 : i32, i32, i32
  }
  func.func @transform_9(%arg0: i32, %arg1: memref<2x8xi32, #tpu.memory_space<smem>>) -> (i32, i32, i32) {
    %c0_i32 = arith.constant 0 : i32
    %c0_i32_0 = arith.constant 0 : i32
    %c0_i32_1 = arith.constant 0 : i32
    %c0_i32_2 = arith.constant 0 : i32
    return %c0_i32, %c0_i32_0, %c0_i32_1 : i32, i32, i32
  }
  func.func @transform_10(%arg0: i32, %arg1: memref<2x8xi32, #tpu.memory_space<smem>>) -> (i32, i32, i32) {
    %c0_i32 = arith.constant 0 : i32
    %c0_i32_0 = arith.constant 0 : i32
    %c0_i32_1 = arith.constant 0 : i32
    %c0_i32_2 = arith.constant 0 : i32
    return %c0_i32, %c0_i32_0, %c0_i32_1 : i32, i32, i32
  }
  func.func @transform_11(%arg0: i32, %arg1: memref<2x8xi32, #tpu.memory_space<smem>>) -> (i32, i32, i32) {
    %c0_i32 = arith.constant 0 : i32
    %c0_i32_0 = arith.constant 0 : i32
    %c0_i32_1 = arith.constant 0 : i32
    %c0_i32_2 = arith.constant 0 : i32
    return %c0_i32, %c0_i32_0, %c0_i32_1 : i32, i32, i32
  }
  func.func @transform_12(%arg0: i32, %arg1: memref<2x8xi32, #tpu.memory_space<smem>>) -> (i32, i32) {
    %c0_i32 = arith.constant 0 : i32
    %c0_i32_0 = arith.constant 0 : i32
    %c0_i32_1 = arith.constant 0 : i32
    return %c0_i32, %c0_i32_0 : i32, i32
  }
  func.func @transform_13(%arg0: i32, %arg1: memref<2x8xi32, #tpu.memory_space<smem>>) -> (i32, i32) {
    %c0_i32 = arith.constant 0 : i32
    %c0_i32_0 = arith.constant 0 : i32
    %c0_i32_1 = arith.constant 0 : i32
    return %c0_i32, %c0_i32_0 : i32, i32
  }
  func.func @transform_14(%arg0: i32, %arg1: memref<2x8xi32, #tpu.memory_space<smem>>) -> (i32, i32, i32) {
    %c0_i32 = arith.constant 0 : i32
    %c0_i32_0 = arith.constant 0 : i32
    %c0_i32_1 = arith.constant 0 : i32
    return %arg0, %c0_i32, %c0_i32_0 : i32, i32, i32
  }
}

</mosaic_0001>

<bundles_post_ra>
// kernel: transformer_forward.1
= control target key start
LH: loop header
LB: loop body
LE: loop exit
PB: predicated region body
PF: predicated region fallthrough
CT: control target
= control target key end

     0   :  { %s4925_s0 = inlined_call_operand.vmem [shape: s32[2,8], index: 0, kind: input, shape index: {}]   ;;  %s4926_s1 = inlined_call_operand.vmem [shape: f32[64,32], index: 1, kind: input, shape index: {}]   ;;  %s4927_s2 = inlined_call_operand.vmem [shape: f32[8,32], index: 2, kind: input, shape index: {}]   ;;  %s4928_s3 = inlined_call_operand.vmem [shape: f32[2,96,32], index: 3, kind: input, shape index: {}]   ;;  %s4929_s4 = inlined_call_operand.vmem [shape: f32[2,32,32], index: 4, kind: input, shape index: {}]   ;;  %s4930_s5 = inlined_call_operand.vmem [shape: f32[2,1,32], index: 5, kind: input, shape index: {}]   ;;  %s4931_s6 = inlined_call_operand.vmem [shape: f32[2,1,32], index: 6, kind: input, shape index: {}]   ;;  %s4932_s7 = inlined_call_operand.vmem [shape: f32[2,128,32], index: 7, kind: input, shape index: {}]   ;;  %s4933_s8 = inlined_call_operand.vmem [shape: f32[2,1,128], index: 8, kind: input, shape index: {}]   ;;  %s4934_s9 = inlined_call_operand.vmem [shape: f32[2,32,128], index: 9, kind: input, shape index: {}]   ;;  %s4935_s10 = inlined_call_operand.vmem [shape: f32[2,1,32], index: 10, kind: input, shape index: {}]   ;;  %s4936_s11 = inlined_call_operand.vmem [shape: f32[2,1,32], index: 11, kind: input, shape index: {}]   ;;  %s4937_s12 = inlined_call_operand.vmem [shape: f32[2,1,32], index: 12, kind: input, shape index: {}]   ;;  %s4938_s13 = inlined_call_operand.vmem [shape: f32[64,32], index: 13, kind: input, shape index: {}]   ;;  %s4939_s14 = inlined_call_operand.vmem [shape: f32[1,64], index: 14, kind: input, shape index: {}]   ;;  %s4940_s15 = inlined_call_operand.hbm [shape: f32[2,8,64], index: 15, kind: output, shape index: {}]  }
   0x1   :  { %4956 = sst [smem:[#allocation14_spill]] %s4940_s15  ;;  %s20_s20 = sshll.u32 %s4925_s0, 4  ;;  %s21_s20 = int_to_ptr.vmem [resolvable:$true] %s20_s20 }
   0x2   :  { %s3973_s21 = scalar_lea.vmem %s21_s20, 32  ;;  %p3978_p1 = scmp.lt.s32.totalorder %s21_s20, %s21_s20 }
   0x3   :  { %p3974_p0 = scmp.ne.s32.totalorder %s21_s20, %s3973_s21  ;;  %p3979_p2 = scmp.lt.s32.totalorder %s3973_s21, %s3973_s21 }
   0x5   :  { %p3980_p3 = por %p3979_p2, %p3978_p1 }
   0x7   :  { %p3981_p4 = pnand %p3980_p3, %p3974_p0 }
   0x9   :  { %3984 = shalt.err (!%p3981_p4)  }
   0xa   :  { %s4051_s22 = smov [#allocation3]  }
   0xb   :  { %23 = dma.vmem_to_smem %s21_s20, 32, %s4051_s22, [#allocation2] }
   0xc   :  { %4029 = dma.done.wait [#allocation2], 32 }
   0xd   :  { %4030 = vsyncadd [#allocation2], 4294967264 }
   0xe   :  { %25 = sfence }
   0xf   :  { %26 = vsyncpa [#allocation5], 0 }
  0x10   :  { %28 = vsyncpa [#allocation5 + $0x1], 0  ;;  %s4153_s23 = smov 0   ;;  %s4155_s24 = smov 0  }
  0x11   :  { %s4157_s0 = smov 0   ;;  %s4159_s25 = smov 0  }
  0x12 LB: > { %4957 = sst [smem:[#allocation8_spill]] %s4037_s23  ;;  %s3122_s26 = sadd.s32 4294967295, %s4049_s25   ;;  %s4049_s25 = sphi %s4159_s25, %s4981_s25   ;;  %s4045_s0 = sphi %s4157_s0, %s4983_s0   ;;  %s4041_s24 = sphi %s4155_s24, %s4985_s24   ;;  %s4037_s23 = sphi %s4153_s23, %s4984_s23  }
  0x13   : > { %4958 = sst [smem:[#allocation9_spill]] %s4045_s0  ;;  %s3123_s27 = sadd.s32 4294967294, %s4049_s25  }
  0x14   : > { %4959 = sst [smem:[#allocation10_spill]] %s4049_s25  ;;  %s4176_s28 = sadd.s32 1, %s4049_s25  }
  0x15   : > { %4960 = sst [smem:[#allocation11_spill]] %s4176_s28  ;;  %s335_s29 = sadd.s32 1, %s4045_s0 }
  0x16   : > { %s332_s30 = ssub.s32 %s4049_s25, %s4176_s28  ;;  %p345_p5 = scmp.ne.s32.totalorder %s4045_s0, %s4041_s24 }
  0x17   : > { %p333_p6 = scmp.eq.s32.totalorder %s332_s30, 0  ;;  %p346_p7 = scmp.eq.s32.totalorder %s3122_s26, 1 }
  0x18   : > { %p351_p8 = scmp.ne.s32.totalorder %s4041_s24, %s4037_s23  ;;  %p352_p9 = scmp.eq.s32.totalorder %s3123_s27, 1 }
  0x19   : > { %s4186_s16 = scalar_select %p333_p6, %s4045_s0, %s335_s29  }
  0x1a   : > { %p4188_p10 = por %p346_p7, %p345_p5  ;;  %p4192_p11 = por %p352_p9, %p351_p8 }
  0x1b   : > { %4961 = sst [smem:[#allocation12_spill]] %s4186_s16  ;;  %p3125_p12 = scmp.ge.s32.totalorder %s4049_s25, 1 }
  0x1c   : > { %s4963_s18 = scalar_select %p4192_p11, 1, 0 }
  0x1d   : > { %p412_p13 = scmp.lt.s32.totalorder %s4049_s25, 3 }
  0x1e   : > { %4964 = sst [smem:[#allocation13_spill]] %s4963_s18 }
  0x1f   : > { %p413_p0 = pnand %p3125_p12, %p412_p13 }
  0x20   : > { %v496_v0 = vld [vmem:[%s4926_s1] sm:$0xff] (!%p413_p0)  ;;  %v497_v1 = vld [vmem:[%s4926_s1 + $0x8] sm:$0xff] (!%p413_p0)  ;;  %v498_v2 = vld [vmem:[%s4926_s1 + $0x10] sm:$0xff] (!%p413_p0)  ;;  %v453_v3 = vlaneseq (!%p413_p0)  ;;  %v4052_v4 = vmov (!%p413_p0), 0.0|0.0   ;;  %vm4053_vm0 = vmmov (!%p413_p0), 0   ;;  %v4054_v7 = vmov (!%p413_p0), 0.0  }
  0x21   : > { %416 = sbr.rel (%p413_p0) target bundleno = 7582 (0x1d9e), region = 76  ;;  %3708 = vmatprep.subr.bf16.mxu0 (!%p413_p0), %v4052_v4  ;;  %v3709_v5 = vpack.c.bf16 (!%p413_p0), %v497_v1, %v496_v0  ;;  %v499_v6 = vld [vmem:[%s4926_s1 + $0x18] sm:$0xff] (!%p413_p0)  ;;  %3438 = vmatprep.mubr.msk.f32.mxu0 (!%p413_p0), %vm4053_vm0, %v4054_v7  ;;  %s4213_s19 = sshll.u32 (!%p413_p0), %s3122_s26, 7  ;;  %v500_v9 = vld [vmem:[%s4926_s1 + $0x20] sm:$0xff] (!%p413_p0)  ;;  %v501_v11 = vld [vmem:[%s4926_s1 + $0x28] sm:$0xff] (!%p413_p0)  ;;  %vm594_vm1 = vcmask (!%p413_p0), 261120  }
  0x22   : > { %s4216_s20 = sld [smem:[#allocation3 + %s4213_s19]] (!%p413_p0)  ;;  %s458_s21 = sadd.s32 (!%p413_p0), 1, %s4213_s19  ;;  %3720 = vmatprep.subr.bf16.mxu1 (!%p413_p0), %v4052_v4  ;;  %3465 = vmatprep.mubr.msk.f32.mxu1 (!%p413_p0), %vm4053_vm0, %v4054_v7  ;;  %v3712_v8 = vpack.c.bf16 (!%p413_p0), %v499_v6, %v498_v2  ;;  %v582_v10 = vld [vmem:[%s4928_s3] sm:$0xff] (!%p413_p0)  ;;  %v454_v12 = vand.u32 (!%p413_p0), 127, %v453_v3  ;;  %v580_v13 = vshrl.u32 (!%p413_p0), %v453_v3, 7  ;;  %v583_v14 = vld [vmem:[%s4928_s3 + $0x8] sm:$0xff] (!%p413_p0)  ;;  %vm4253_vm3 = vmpackc.low (!%p413_p0), %vm594_vm1, %vm594_vm1  ;;  %v3715_v18 = vpack.c.bf16 (!%p413_p0), %v501_v11, %v500_v9 }
  0x23   : > { %3710 = vmatpush3.bf16.msra.mxu0 (!%p413_p0), %v3709_v5  ;;  %s4225_s26 = sld [smem:[#allocation3 + %s458_s21]] (!%p413_p0)  ;;  %s461_s27 = sadd.s32 (!%p413_p0), 2, %s4213_s19  ;;  %v3721_v15 = vpack.c.bf16 (!%p413_p0), %v583_v14, %v582_v10  ;;  %v502_v19 = vld [vmem:[%s4926_s1 + $0x30] sm:$0xff] (!%p413_p0)  ;;  %v503_v20 = vld [vmem:[%s4926_s1 + $0x38] sm:$0xff] (!%p413_p0)  ;;  %vm479_vm4 = vcmask (!%p413_p0), 1040384   ;;  %vm481_vm5 = vcmask (!%p413_p0), 1041408  }
  0x24   : > { %3711 = vmatprep.subr.bf16.mxu0 (!%p413_p0), %v4052_v4  ;;  %s4235_s18 = sld [smem:[#allocation3 + %s461_s27]] (!%p413_p0)  ;;  %s464_s23 = sadd.s32 (!%p413_p0), 3, %s4213_s19  ;;  %vm4247_vm2 = vcmp.le.s32.totalorder (!%p413_p0), %v454_v12, %v580_v13  ;;  %v584_v22 = vld [vmem:[%s4928_s3 + $0x10] sm:$0xff] (!%p413_p0)  ;;  %v585_v23 = vld [vmem:[%s4928_s3 + $0x18] sm:$0xff] (!%p413_p0)  ;;  %vm483_vm6 = vcmask (!%p413_p0), 1042432   ;;  %v3718_v25 = vpack.c.bf16 (!%p413_p0), %v503_v20, %v502_v19  ;;  %vm485_vm7 = vcmask (!%p413_p0), 1043456  }
  0x25   : > { %s4241_s22 = sld [smem:[#allocation3 + %s464_s23]] (!%p413_p0)  ;;  %s467_s29 = sadd.s32 (!%p413_p0), 4, %s4213_s19  ;;  %3723 = vmatpush3.bf16.xpose.msk.msra.mxu1 (!%p413_p0), %vm4253_vm3, %v3721_v15  ;;  %vm487_vm8 = vcmask (!%p413_p0), 1044480   ;;  %v3725_v30 = vpack.c.bf16 (!%p413_p0), %v585_v23, %v584_v22  ;;  %vm489_vm9 = vcmask (!%p413_p0), 1045504   ;;  %vm491_vm10 = vcmask (!%p413_p0), 1046528   ;;  %v586_v40 = vld [vmem:[%s4928_s3 + $0x20] sm:$0xff] (!%p413_p0) }
  0x26   : > { %s4244_s30 = sld [smem:[#allocation3 + %s467_s29]] (!%p413_p0)  ;;  %s470_s0 = sadd.s32 (!%p413_p0), 5, %s4213_s19  ;;  %3724 = vmatprep.subr.bf16.mxu1 (!%p413_p0), %v4052_v4  ;;  %vm505_vm11 = vcmask (!%p413_p0), 523264   ;;  %v587_v41 = vld [vmem:[%s4928_s3 + $0x28] sm:$0xff] (!%p413_p0)  ;;  %v588_v44 = vld [vmem:[%s4928_s3 + $0x30] sm:$0xff] (!%p413_p0)  ;;  %v589_v45 = vld [vmem:[%s4928_s3 + $0x38] sm:$0xff] (!%p413_p0) }
  0x27   : > { %3713 = vmatpush3.bf16.msra.mxu0 (!%p413_p0), %v3712_v8  ;;  %s4263_s21 = sld [smem:[#allocation3 + %s470_s0]] (!%p413_p0)  ;;  %s473_s29 = sadd.s32 (!%p413_p0), 6, %s4213_s19  ;;  %v3729_v43 = vpack.c.bf16 (!%p413_p0), %v587_v41, %v586_v40  ;;  %v3733_v46 = vpack.c.bf16 (!%p413_p0), %v589_v45, %v588_v44  ;;  %v590_v47 = vld [vmem:[%s4928_s3 + $0x40] sm:$0xff] (!%p413_p0)  ;;  %v591_v48 = vld [vmem:[%s4928_s3 + $0x48] sm:$0xff] (!%p413_p0)  ;;  %v592_v50 = vld [vmem:[%s4928_s3 + $0x50] sm:$0xff] (!%p413_p0)  ;;  %vm708_vm13 = vcmask (!%p413_p0), 64512  }
  0x28   : > { %3714 = vmatprep.subr.bf16.mxu0 %v4052_v4  ;;  %v457_v21 = vstv %s4216_s20  ;;  %s474_s25 = sld [smem:[#allocation3 + %s473_s29]]  ;;  %s476_s15 = sadd.s32 7, %s4213_s19  ;;  %v3737_v49 = vpack.c.bf16 %v591_v48, %v590_v47  ;;  %v593_v51 = vld [vmem:[%s4928_s3 + $0x58] sm:$0xff]  ;;  %v504_v53 = vld [vmem:[%s4927_s2] sm:$0xff]  ;;  %vm1383_vm14 = vcmask 130048   ;;  %vm1385_vm15 = vcmask 195584  }
  0x29   : > { %v460_v24 = vstv %s4225_s26  ;;  %s477_s16 = sld [smem:[#allocation3 + %s476_s15]]  ;;  %v3741_v52 = vpack.c.bf16 %v593_v51, %v592_v50  ;;  %s4059_s29 = smov 80   ;;  %v3278_v17 = vld [vmem:[%s4939_s14] ss:$0 sm:$0xff] }
  0x2a   : > { %v463_v26 = vstv %s4235_s18  ;;  %v480_v27 = vsel %vm479_vm4, %v457_v21, %v460_v24  ;;  %s4060_s23 = smov 120   ;;  %s4061_s28 = smov 112  }
  0x2b   : > { %3716 = vmatpush3.bf16.msra.mxu0 %v3715_v18  ;;  %v466_v28 = vstv %s4241_s22  ;;  %v482_v29 = vsel %vm481_vm5, %v480_v27, %v463_v26  ;;  %s4056_s22 = smov 96   ;;  %s4950_s0 = smov 48  }
  0x2c   : > { %3717 = vmatprep.subr.bf16.mxu0 %v4052_v4  ;;  %v469_v31 = vstv %s4244_s30  ;;  %v484_v32 = vsel %vm483_vm6, %v482_v29, %v466_v28  ;;  %s4057_s30 = smov 88   ;;  %s4953_s27 = smov 72  }
  0x2d   : > { %v472_v33 = vstv %s4263_s21  ;;  %v486_v34 = vsel %vm485_vm7, %v484_v32, %v469_v31  ;;  %3727 = vmatpush3.bf16.xpose.msk.msra.mxu1 %vm4253_vm3, %v3725_v30  ;;  %s4952_s21 = smov 56   ;;  %s4948_s15 = smov 40  }
  0x2e   : > { %v475_v35 = vstv %s474_s25  ;;  %v488_v36 = vsel %vm487_vm8, %v486_v34, %v472_v33  ;;  %3728 = vmatprep.subr.bf16.mxu1 %v4052_v4  ;;  %s4954_s25 = smov 64   ;;  %s4949_s18 = smov 8  }
  0x2f   : > { %3719 = vmatpush3.bf16.msra.mxu0 %v3718_v25  ;;  %v478_v37 = vstv %s477_s16  ;;  %v490_v38 = vsel %vm489_vm9, %v488_v36, %v475_v35  ;;  %s4064_s16 = smov 104   ;;  %s4951_s20 = smov 16  }
  0x30   : > { %v492_v39 = vsel %vm491_vm10, %v490_v38, %v478_v37  ;;  %3468 = vmatprep.subr.mxu0 %v4054_v7 }
  0x31   : > { %vm493_vm12 = vcmp.eq.s32.totalorder %v492_v39, %v454_v12 }
  0x32   : > { %v3128_v42 = vsel %vm493_vm12, 1.0, %v4054_v7 }
  0x33   : > { %3439 = vmatmul.mubr.msk.f32.vlgmr.msra.gmra.mrb[0].mxu0 %vm505_vm11, %v3128_v42 }
  0x34   : > { %3470 = vmatprep.mubr.msk.f32.mxu0 %vm4053_vm0, %v4054_v7 }
  0x35   : > { %3731 = vmatpush3.bf16.xpose.msk.msra.mxu1 %vm4253_vm3, %v3729_v43 }
  0x36   : > { %3732 = vmatprep.subr.bf16.mxu1 %v4052_v4 }
  0x3d   : > { %3735 = vmatpush3.bf16.xpose.msk.msra.mxu1 %vm4253_vm3, %v3733_v46 }
  0x3e   : > { %3736 = vmatprep.subr.bf16.mxu1 %v4052_v4 }
  0x45   : > { %3739 = vmatpush3.bf16.xpose.msk.msra.mxu1 %vm4253_vm3, %v3737_v49 }
  0x46   : > { %3740 = vmatprep.subr.bf16.mxu1 %v4052_v4 }
  0x4d   : > { %3743 = vmatpush3.bf16.xpose.msk.msra.mxu1 %vm4253_vm3, %v3741_v52 }
  0x4e   : > { %3752 = vmatprep.subr.bf16.mxu1 %v4052_v4 }
 0x106   : > { %v575_v54 = vpop.f32.mrb[0].mxu0 }
 0x107   : > { %v4331_v55 = vadd.f32 %v575_v54, %v504_v53  ;;  %v3440_v56 = vpop.f32.mrb[1].mxu0 }
 0x109   : > { %3466 = vmatmul.mubr.msk.f32.vlgmr.msra.gmra.mrb[0].mxu1 %vm594_vm1, %v4331_v55 }
 0x10a   : > { %3551 = vmatprep.mubr.msk.f32.mxu1 %vm4053_vm0, %v4054_v7 }
 0x1dc   : > { %v4337_v57 = vpop.f32.mrb[0].mxu1 }
 0x1dd   : > { %796 = vrot.lane.b32.xlu1 %v4337_v57, %s4954_s25  ;;  %706 = vrot.lane.b32.xlu0 %v4337_v57, %s4056_s22  ;;  %v3467_v58 = vpop.f32.mrb[1].mxu1  ;;  %v4347_v60 = vmul.f32 0.35355338, %v4337_v57 }
 0x1e1   : > { %874 = vrot.lane.b32.xlu1 %v4337_v57, %s4057_s30 }
 0x24f   : > { %v707_v59 = vpop.permute.xlu0 %706  ;;  %v797_v61 = vpop.permute.xlu1 %796 }
 0x250   : > { %3469 = vmatpush3.xpose.msk.msra.mxu0 %vm708_vm13, %v707_v59 }
 0x251   : > { %3473 = vmatprep.subr.mxu0 %v4054_v7 }
 0x253   : > { %3471 = vmatmul.mubr.msk.f32.vlgmr.msra.gmra.mrb[2].mxu0 %vm708_vm13, %v4347_v60  ;;  %v875_v9 = vpop.permute.xlu1 %874 }
 0x254   : > { %3474 = vmatpush3.msra.mxu0 %v797_v61  ;;  %3475 = vmatprep.mubr.msk.f32.mxu0 %vm4053_vm0, %v4054_v7 }
 0x255   : > { %3478 = vmatprep.subr.mxu0 %v4054_v7 }
 0x326   : > { %v780_v62 = vpop.f32.mrb[2].mxu0 }
 0x327   : > { %v784_v63 = vsel %vm4247_vm2, %v780_v62, -1e+30  ;;  %v3472_v0 = vpop.f32.mrb[3].mxu0 }
 0x328   : > { %v785_v1 = vsel %vm708_vm13, %v784_v63, -inf }
 0x329   : > { %786 = vmax.xlane.f32.xlu0 %v785_v1 }
 0x33f   : > { %962 = vrot.lane.b32.xlu0 %v4337_v57, %s4952_s21 }
 0x343   : > { %1040 = vrot.lane.b32.xlu0 %v4337_v57, %s4059_s29 }
 0x3b6   : > { %v787_v2 = vpop.xlane.xlu0 %786 }
 0x3b7   : > { %v788_v3 = vsub.f32 %v784_v63, %v787_v2 }
 0x3b9   : > { %v789_v5 = vmul.f32 1.442695, %v788_v3  ;;  %v1388_v3 = vld [vmem:[%s4929_s4 + $0x8] sm:$0xff] }
 0x3ba   : > { %v963_v14 = vpop.permute.xlu0 %962 }
 0x3bb   : > { %3933 = vpow2.f32 %v789_v5 }
 0x3be   : > { %v1041_v28 = vpop.permute.xlu0 %1040 }
 0x3c5   : > { %v3934_v6 = vpop.eup %3933 }
 0x3c6   : > { %v791_v8 = vsel %vm708_vm13, %v3934_v6, 0.0 }
 0x3c7   : > { %792 = vadd.xlane.f32.xlu1 %v791_v8  ;;  %v1390_v8 = vld [vmem:[%s4929_s4 + $0x18] sm:$0xff] }
 0x3d8   : > { %872 = vrot.lane.b32.xlu1 %v4347_v60, %s4060_s23 }
 0x454   : > { %v793_v10 = vpop.xlane.xlu1 %792 }
 0x455   : > { %3935 = vrcp.f32 %v793_v10 }
 0x458   : > { %v873_v13 = vpop.permute.xlu1 %872 }
 0x45f   : > { %v3936_v11 = vpop.eup %3935 }
 0x460   : > { %v795_v12 = vmul.f32 %v3936_v11, %v3934_v6  ;;  %v1389_v6 = vld [vmem:[%s4929_s4 + $0x10] sm:$0xff] }
 0x462   : > { %3476 = vmatmul.mubr.msk.f32.vlgmr.msra.gmra.mrb[4].mxu0 %vm708_vm13, %v795_v12 }
 0x463   : > { %3479 = vmatpush3.xpose.msk.msra.mxu0 %vm708_vm13, %v875_v9  ;;  %3480 = vmatprep.mubr.msk.f32.mxu0 %vm4053_vm0, %v4054_v7  ;;  %v3749_v9 = vpack.c.bf16 %v1390_v8, %v1389_v6  ;;  %v3162_v6 = vld [vmem:[%s4933_s8] ss:$0 sm:$0xff] }
 0x464   : > { %3483 = vmatprep.subr.mxu0 %v4054_v7 }
 0x466   : > { %3481 = vmatmul.mubr.msk.f32.vlgmr.msra.gmra.mrb[6].mxu0 %vm708_vm13, %v873_v13 }
 0x467   : > { %3484 = vmatpush3.msra.mxu0 %v963_v14  ;;  %3485 = vmatprep.mubr.msk.f32.mxu0 %vm4053_vm0, %v4054_v7 }
 0x468   : > { %3488 = vmatprep.subr.mxu0 %v4054_v7 }
 0x535   : > { %v4374_v15 = vpop.f32.mrb[4].mxu0 }
 0x536   : > { %v3477_v18 = vpop.f32.mrb[5].mxu0 }
 0x539   : > { %v946_v19 = vpop.f32.mrb[6].mxu0 }
 0x53a   : > { %v950_v20 = vsel %vm4247_vm2, %v946_v19, -1e+30  ;;  %v3482_v21 = vpop.f32.mrb[7].mxu0 }
 0x53b   : > { %v951_v22 = vsel %vm708_vm13, %v950_v20, -inf }
 0x53c   : > { %952 = vmax.xlane.f32.xlu1 %v951_v22 }
 0x5c9   : > { %v953_v23 = vpop.xlane.xlu1 %952 }
 0x5ca   : > { %v954_v24 = vsub.f32 %v950_v20, %v953_v23 }
 0x5cc   : > { %v955_v25 = vmul.f32 1.442695, %v954_v24 }
 0x5ce   : > { %3937 = vpow2.f32 %v955_v25  ;;  %v1508_v25 = vld [vmem:[%s4932_s7 + $0x8] sm:$0xff] }
 0x5d8   : > { %v3938_v26 = vpop.eup %3937 }
 0x5d9   : > { %v957_v27 = vsel %vm708_vm13, %v3938_v26, 0.0 }
 0x5da   : > { %958 = vadd.xlane.f32.xlu0 %v957_v27  ;;  %v1509_v27 = vld [vmem:[%s4932_s7 + $0x10] sm:$0xff] }
 0x5f0   : > { %1038 = vrot.lane.b32.xlu0 %v4347_v60, %s4061_s28 }
 0x667   : > { %v959_v29 = vpop.xlane.xlu0 %958 }
 0x668   : > { %3939 = vrcp.f32 %v959_v29 }
 0x66b   : > { %v1039_v32 = vpop.permute.xlu0 %1038 }
 0x672   : > { %v3940_v30 = vpop.eup %3939 }
 0x673   : > { %v961_v31 = vmul.f32 %v3940_v30, %v3938_v26  ;;  %v1511_v30 = vld [vmem:[%s4932_s7 + $0x20] sm:$0xff] }
 0x675   : > { %3486 = vmatmul.mubr.msk.f32.vlgmr.msra.gmra.mrb[8].mxu0 %vm708_vm13, %v961_v31  ;;  %v1512_v31 = vld [vmem:[%s4932_s7 + $0x28] sm:$0xff] }
 0x676   : > { %3489 = vmatpush3.xpose.msk.msra.mxu0 %vm708_vm13, %v1041_v28  ;;  %3490 = vmatprep.mubr.msk.f32.mxu0 %vm4053_vm0, %v4054_v7  ;;  %v1510_v28 = vld [vmem:[%s4932_s7 + $0x18] sm:$0xff] }
 0x677   : > { %3493 = vmatprep.subr.mxu0 %v4054_v7  ;;  %v3757_v29 = vpack.c.bf16 %v1510_v28, %v1509_v27  ;;  %v3189_v28 = vld [vmem:[%s4928_s3 + $0x90] sm:$0xff] }
 0x679   : > { %3491 = vmatmul.mubr.msk.f32.vlgmr.msra.gmra.mrb[10].mxu0 %vm708_vm13, %v1039_v32  ;;  %v3761_v32 = vpack.c.bf16 %v1512_v31, %v1511_v30 }
 0x67a   : > { %3495 = vmatprep.mubr.msk.f32.mxu0 %vm4053_vm0, %v4054_v7 }
 0x748   : > { %v1034_v33 = vpop.f32.mrb[8].mxu0 }
 0x749   : > { %v3487_v34 = vpop.f32.mrb[9].mxu0 }
 0x74a   : > { %v1514_v34 = vld [vmem:[%s4932_s7 + $0x38] sm:$0xff] }
 0x74c   : > { %v1112_v35 = vpop.f32.mrb[10].mxu0 }
 0x74d   : > { %v1116_v36 = vsel %vm4247_vm2, %v1112_v35, -1e+30  ;;  %v3492_v37 = vpop.f32.mrb[11].mxu0 }
 0x74e   : > { %v1117_v38 = vsel %vm708_vm13, %v1116_v36, -inf  ;;  %v1516_v37 = vld [vmem:[%s4932_s7 + $0x48] sm:$0xff] }
 0x74f   : > { %1118 = vmax.xlane.f32.xlu1 %v1117_v38 }
 0x760   : > { %1128 = vrot.lane.b32.xlu1 %v4337_v57, %s4950_s0  ;;  %s4955_s0 = smov 24  }
 0x764   : > { %1206 = vrot.lane.b32.xlu1 %v4337_v57, %s4953_s27  ;;  %s4069_s27 = smov [#allocation4]  }
 0x768   : > { %1204 = vrot.lane.b32.xlu1 %v4347_v60, %s4064_s16 }
 0x7dc   : > { %v1119_v39 = vpop.xlane.xlu1 %1118 }
 0x7dd   : > { %v1120_v40 = vsub.f32 %v1116_v36, %v1119_v39  ;;  %v1515_v36 = vld [vmem:[%s4932_s7 + $0x40] sm:$0xff]  ;;  %v1517_v39 = vld [vmem:[%s4932_s7 + $0x50] sm:$0xff] }
 0x7de   : > { %v3769_v38 = vpack.c.bf16 %v1516_v37, %v1515_v36  ;;  %v3191_v36 = vld [vmem:[%s4928_s3 + $0xa0] sm:$0xff]  ;;  %v3192_v37 = vld [vmem:[%s4928_s3 + $0xa8] sm:$0xff] }
 0x7df   : > { %v1121_v41 = vmul.f32 1.442695, %v1120_v40  ;;  %v1518_v40 = vld [vmem:[%s4932_s7 + $0x58] sm:$0xff] }
 0x7e0   : > { %v1129_v42 = vpop.permute.xlu1 %1128 }
 0x7e1   : > { %3941 = vpow2.f32 %v1121_v41  ;;  %3494 = vmatpush3.msra.mxu0 %v1129_v42  ;;  %v3773_v41 = vpack.c.bf16 %v1518_v40, %v1517_v39  ;;  %v3193_v39 = vld [vmem:[%s4928_s3 + $0xb0] sm:$0xff]  ;;  %v3194_v40 = vld [vmem:[%s4928_s3 + $0xb8] sm:$0xff] }
 0x7e2   : > { %3498 = vmatprep.subr.mxu0 %v4054_v7 }
 0x7e4   : > { %v1207_v47 = vpop.permute.xlu1 %1206 }
 0x7e8   : > { %v1205_v49 = vpop.permute.xlu1 %1204 }
 0x7eb   : > { %v3942_v43 = vpop.eup %3941 }
 0x7ec   : > { %v1123_v44 = vsel %vm708_vm13, %v3942_v43, 0.0 }
 0x7ed   : > { %1124 = vadd.xlane.f32.xlu0 %v1123_v44 }
 0x87a   : > { %v1125_v45 = vpop.xlane.xlu0 %1124 }
 0x87b   : > { %3943 = vrcp.f32 %v1125_v45 }
 0x885   : > { %v3944_v46 = vpop.eup %3943 }
 0x886   : > { %v1127_v48 = vmul.f32 %v3944_v46, %v3942_v43 }
 0x888   : > { %3496 = vmatmul.mubr.msk.f32.vlgmr.msra.gmra.mrb[12].mxu0 %vm708_vm13, %v1127_v48  ;;  %v1520_v48 = vld [vmem:[%s4932_s7 + $0x68] sm:$0xff] }
 0x889   : > { %3499 = vmatpush3.xpose.msk.msra.mxu0 %vm708_vm13, %v1207_v47  ;;  %3500 = vmatprep.mubr.msk.f32.mxu0 %vm4053_vm0, %v4054_v7  ;;  %v1519_v47 = vld [vmem:[%s4932_s7 + $0x60] sm:$0xff] }
 0x88a   : > { %3503 = vmatprep.subr.mxu0 %v4054_v7 }
 0x88c   : > { %3501 = vmatmul.mubr.msk.f32.vlgmr.msra.gmra.mrb[14].mxu0 %vm708_vm13, %v1205_v49  ;;  %v3777_v49 = vpack.c.bf16 %v1520_v48, %v1519_v47  ;;  %v3182_v48 = vld [vmem:[%s4937_s12] ss:$0 sm:$0xff] }
 0x88d   : > { %3505 = vmatprep.mubr.msk.f32.mxu0 %vm4053_vm0, %v4054_v7 }
 0x95b   : > { %v1200_v50 = vpop.f32.mrb[12].mxu0 }
 0x95c   : > { %v3497_v51 = vpop.f32.mrb[13].mxu0 }
 0x95d   : > { %v1522_v51 = vld [vmem:[%s4932_s7 + $0x78] sm:$0xff] }
 0x95f   : > { %v1278_v52 = vpop.f32.mrb[14].mxu0 }
 0x960   : > { %v1282_v53 = vsel %vm4247_vm2, %v1278_v52, -1e+30  ;;  %v3502_v54 = vpop.f32.mrb[15].mxu0 }
 0x961   : > { %v1283_v56 = vsel %vm708_vm13, %v1282_v53, -inf  ;;  %v1653_v54 = vld [vmem:[%s4934_s9 + $0x8] sm:$0xff] }
 0x962   : > { %1284 = vmax.xlane.f32.xlu1 %v1283_v56 }
 0x9ef   : > { %v1285_v58 = vpop.xlane.xlu1 %1284 }
 0x9f0   : > { %v1286_v59 = vsub.f32 %v1282_v53, %v1285_v58  ;;  %v1652_v53 = vld [vmem:[%s4934_s9] sm:$0xff]  ;;  %v1654_v58 = vld [vmem:[%s4934_s9 + $0x10] sm:$0xff] }
 0x9f1   : > { %v3785_v56 = vpack.c.bf16 %v1653_v54, %v1652_v53 }
 0x9f2   : > { %v1287_v60 = vmul.f32 1.442695, %v1286_v59  ;;  %v1655_v59 = vld [vmem:[%s4934_s9 + $0x18] sm:$0xff] }
 0x9f4   : > { %3945 = vpow2.f32 %v1287_v60  ;;  %v3788_v60 = vpack.c.bf16 %v1655_v59, %v1654_v58 }
 0x9fe   : > { %v3946_v61 = vpop.eup %3945 }
 0x9ff   : > { %v1289_v62 = vsel %vm708_vm13, %v3946_v61, 0.0 }
 0xa00   : > { %1290 = vadd.xlane.f32.xlu0 %v1289_v62 }
 0xa16   : > { %1294 = vrot.lane.b32.xlu0 %v4337_v57, %s4948_s15  ;;  %v1387_v57 = vld [vmem:[%s4929_s4] sm:$0xff]  ;;  %s4974_s15 = smov 8  }
 0xa17   : > { %v3745_v5 = vpack.c.bf16 %v1388_v3, %v1387_v57  ;;  %v3161_v57 = vld [vmem:[%s4931_s6] ss:$0 sm:$0xff] }
 0xa1a   : > { %1371 = vrot.lane.b32.xlu0 %v1034_v33, %s4949_s18  ;;  %v1513_v33 = vld [vmem:[%s4932_s7 + $0x30] sm:$0xff] }
 0xa1b   : > { %v3765_v35 = vpack.c.bf16 %v1514_v34, %v1513_v33 }
 0xa1e   : > { %1375 = vrot.lane.b32.xlu0 %v1200_v50, %s4951_s20  ;;  %v1521_v50 = vld [vmem:[%s4932_s7 + $0x70] sm:$0xff]  ;;  %s4977_s20 = sld [smem:[#allocation14_spill]] }
 0xa1f   : > { %v3781_v52 = vpack.c.bf16 %v1522_v51, %v1521_v50 }
 0xa24   : > { %s4882_s26 = scalar_lea.hbm %s4977_s20, %s4213_s19 }
 0xa8d   : > { %v1291_v63 = vpop.xlane.xlu0 %1290 }
 0xa8e   : > { %3947 = vrcp.f32 %v1291_v63 }
 0xa91   : > { %v1295_v0 = vpop.permute.xlu0 %1294 }
 0xa92   : > { %3504 = vmatpush3.msra.mxu0 %v1295_v0 }
 0xa93   : > { %3744 = vmatprep.subr.bf16.mxu0 %v4052_v4 }
 0xa95   : > { %v1372_v12 = vpop.permute.xlu0 %1371 }
 0xa96   : > { %v1382_v14 = vsel %vm708_vm13, %v4374_v15, %v1372_v12  ;;  %v1507_v15 = vld [vmem:[%s4932_s7] sm:$0xff] }
 0xa97   : > { %v3753_v26 = vpack.c.bf16 %v1508_v25, %v1507_v15  ;;  %v3180_v12 = vld [vmem:[%s4935_s10] ss:$0 sm:$0xff] }
 0xa98   : > { %v3948_v1 = vpop.eup %3947  ;;  %v3187_v25 = vld [vmem:[%s4928_s3 + $0x80] sm:$0xff] }
 0xa99   : > { %v1293_v2 = vmul.f32 %v3948_v1, %v3946_v61  ;;  %v1376_v13 = vpop.permute.xlu0 %1375  ;;  %3755 = vmatpush3.bf16.xpose.msk.msra.mxu1 %vm4253_vm3, %v3753_v26  ;;  %v3160_v1 = vld [vmem:[%s4930_s5] ss:$0 sm:$0xff]  ;;  %v3188_v26 = vld [vmem:[%s4928_s3 + $0x88] sm:$0xff] }
 0xa9a   : > { %v1384_v18 = vsel %vm1383_vm14, %v1382_v14, %v1376_v13  ;;  %3756 = vmatprep.subr.bf16.mxu1 %v4052_v4  ;;  %v3799_v27 = vpack.c.bf16 %v3188_v26, %v3187_v25 }
 0xa9b   : > { %3506 = vmatmul.mubr.msk.f32.vlgmr.msra.gmra.mrb[16].mxu0 %vm708_vm13, %v1293_v2 }
 0xa9c   : > { %3516 = vmatprep.mubr.msk.f32.mxu0 %vm4053_vm0, %v4054_v7  ;;  %3747 = vmatpush3.bf16.xpose.msk.msra.mxu0 %vm4253_vm3, %v3745_v5 }
 0xa9d   : > { %3748 = vmatprep.subr.bf16.mxu0 %v4052_v4 }
 0xaa1   : > { %3759 = vmatpush3.bf16.xpose.msk.msra.mxu1 %vm4253_vm3, %v3757_v29  ;;  %v3190_v29 = vld [vmem:[%s4928_s3 + $0x98] sm:$0xff] }
 0xaa2   : > { %3760 = vmatprep.subr.bf16.mxu1 %v4052_v4  ;;  %v3803_v30 = vpack.c.bf16 %v3190_v29, %v3189_v28 }
 0xaa4   : > { %3751 = vmatpush3.bf16.xpose.msk.msra.mxu0 %vm4253_vm3, %v3749_v9 }
 0xaa5   : > { %3784 = vmatprep.subr.bf16.mxu0 %v4052_v4 }
 0xaa9   : > { %3763 = vmatpush3.bf16.xpose.msk.msra.mxu1 %vm4253_vm3, %v3761_v32 }
 0xaaa   : > { %3764 = vmatprep.subr.bf16.mxu1 %v4052_v4 }
 0xab1   : > { %3767 = vmatpush3.bf16.xpose.msk.msra.mxu1 %vm4253_vm3, %v3765_v35 }
 0xab2   : > { %3768 = vmatprep.subr.bf16.mxu1 %v4052_v4 }
 0xab9   : > { %3771 = vmatpush3.bf16.xpose.msk.msra.mxu1 %vm4253_vm3, %v3769_v38  ;;  %v3807_v38 = vpack.c.bf16 %v3192_v37, %v3191_v36 }
 0xaba   : > { %3772 = vmatprep.subr.bf16.mxu1 %v4052_v4 }
 0xac1   : > { %3775 = vmatpush3.bf16.xpose.msk.msra.mxu1 %vm4253_vm3, %v3773_v41  ;;  %v3811_v41 = vpack.c.bf16 %v3194_v40, %v3193_v39 }
 0xac2   : > { %3776 = vmatprep.subr.bf16.mxu1 %v4052_v4 }
 0xac9   : > { %3779 = vmatpush3.bf16.xpose.msk.msra.mxu1 %vm4253_vm3, %v3777_v49 }
 0xaca   : > { %3780 = vmatprep.subr.bf16.mxu1 %v4052_v4 }
 0xad1   : > { %3783 = vmatpush3.bf16.xpose.msk.msra.mxu1 %vm4253_vm3, %v3781_v52 }
 0xad2   : > { %3592 = vmatprep.subr.mxu1 %v4054_v7 }
 0xb6e   : > { %v1366_v10 = vpop.f32.mrb[16].mxu0 }
 0xb6f   : > { %1379 = vrot.lane.b32.xlu1 %v1366_v10, %s4955_s0  ;;  %v3507_v11 = vpop.f32.mrb[17].mxu0 }
 0xbe1   : > { %v1380_v19 = vpop.permute.xlu1 %1379 }
 0xbe2   : > { %v1386_v20 = vsel %vm1385_vm15, %v1384_v18, %v1380_v19 }
 0xbe3   : > { %3517 = vmatmul.mubr.msk.f32.vlgmr.msra.gmra.mrb[18].mxu0 %vm594_vm1, %v1386_v20 }
 0xbe4   : > { %3562 = vmatprep.mubr.msk.f32.mxu0 %vm4053_vm0, %v4054_v7  ;;  %3786 = vmatpush3.bf16.xpose.msra.mxu0 %v3785_v56 }
 0xbe5   : > { %3787 = vmatprep.subr.bf16.mxu0 %v4052_v4 }
 0xbec   : > { %3789 = vmatpush3.bf16.xpose.msra.mxu0 %v3788_v60 }
 0xbed   : > { %3790 = vmatprep.subr.bf16.mxu0 %v4052_v4 }
 0xcb6   : > { %v1472_v21 = vpop.f32.mrb[18].mxu0 }
 0xcb7   : > { %v1476_v22 = vadd.f32 %v1472_v21, %v4331_v55  ;;  %v3518_v23 = vpop.f32.mrb[19].mxu0  ;;  %v3183_v21 = vld [vmem:[%s4928_s3 + $0x60] sm:$0xff] }
 0xcb9   : > { %v1479_v24 = vsel %vm594_vm1, %v1476_v22, 0.0 }
 0xcba   : > { %1480 = vadd.xlane.f32.xlu0 %v1479_v24  ;;  %v3186_v24 = vld [vmem:[%s4928_s3 + $0x78] sm:$0xff] }
 0xd47   : > { %v1481_v42 = vpop.xlane.xlu0 %1480 }
 0xd48   : > { %v1483_v43 = vmul.f32 0.03125, %v1481_v42 }
 0xd4a   : > { %v1484_v44 = vsub.f32 %v1476_v22, %v1483_v43  ;;  %v3184_v22 = vld [vmem:[%s4928_s3 + $0x68] sm:$0xff] }
 0xd4b   : > { %v3791_v23 = vpack.c.bf16 %v3184_v22, %v3183_v21 }
 0xd4c   : > { %v1485_v45 = vmul.f32 %v1484_v44, %v1484_v44 }
 0xd4e   : > { %v1486_v46 = vsel %vm594_vm1, %v1485_v45, 0.0 }
 0xd4f   : > { %1487 = vadd.xlane.f32.xlu1 %v1486_v46  ;;  %v3181_v46 = vld [vmem:[%s4936_s11] ss:$0 sm:$0xff] }
 0xddc   : > { %v1488_v61 = vpop.xlane.xlu1 %1487 }
 0xddd   : > { %v1489_v62 = vmul.f32 0.03125, %v1488_v61 }
 0xddf   : > { %v1490_v63 = vadd.f32 1e-05, %v1489_v62 }
 0xde1   : > { %3949 = vrsqrt.f32 %v1490_v63 }
 0xdeb   : > { %v3950_v0 = vpop.eup %3949 }
 0xdec   : > { %v1492_v2 = vmul.f32 %v3950_v0, %v1484_v44 }
 0xdee   : > { %v1499_v3 = vmul.f32 %v3160_v1, %v1492_v2 }
 0xdf0   : > { %v1506_v5 = vadd.f32 %v3161_v57, %v1499_v3 }
 0xdf2   : > { %3552 = vmatmul.mubr.msk.f32.vlgmr.msra.gmra.mrb[2].mxu1 %vm594_vm1, %v1506_v5 }
 0xdf3   : > { %3594 = vmatprep.mubr.msk.f32.mxu1 %vm4053_vm0, %v4054_v7 }
 0xec5   : > { %v1647_v8 = vpop.f32.mrb[2].mxu1 }
 0xec6   : > { %v1648_v9 = vadd.f32 %v3162_v6, %v1647_v8  ;;  %v3553_v10 = vpop.f32.mrb[3].mxu1 }
 0xec8   : > { %v1651_v11 = vmax.f32 %v1648_v9, 0.0 }
 0xeca   : > { %3563 = vmatmul.mubr.f32.vlgmr.msra.gmra.mrb[20].mxu0 %v1651_v11 }
 0xecb   : > { %3589 = vmatprep.mubr.msk.f32.mxu0 %vm4053_vm0, %v4054_v7  ;;  %3793 = vmatpush3.bf16.xpose.msk.msra.mxu0 %vm4253_vm3, %v3791_v23 }
 0xecc   : > { %3794 = vmatprep.subr.bf16.mxu0 %v4052_v4 }
 0xf9d   : > { %v1729_v13 = vpop.f32.mrb[20].mxu0 }
 0xf9e   : > { %v1730_v14 = vadd.f32 %v3180_v12, %v1729_v13  ;;  %v3564_v18 = vpop.f32.mrb[21].mxu0 }
 0xfa0   : > { %v1733_v19 = vadd.f32 %v1730_v14, %v4331_v55  ;;  %v3185_v55 = vld [vmem:[%s4928_s3 + $0x70] sm:$0xff] }
 0xfa1   : > { %v3795_v15 = vpack.c.bf16 %v3186_v24, %v3185_v55 }
 0xfa2   : > { %v1736_v20 = vsel %vm594_vm1, %v1733_v19, 0.0 }
 0xfa3   : > { %1737 = vadd.xlane.f32.xlu0 %v1736_v20  ;;  %3797 = vmatpush3.bf16.xpose.msk.msra.mxu0 %vm4253_vm3, %v3795_v15 }
 0xfa4   : > { %3798 = vmatprep.subr.bf16.mxu0 %v4052_v4 }
 0xfab   : > { %3801 = vmatpush3.bf16.xpose.msk.msra.mxu0 %vm4253_vm3, %v3799_v27 }
 0xfac   : > { %3802 = vmatprep.subr.bf16.mxu0 %v4052_v4 }
 0xfb3   : > { %3805 = vmatpush3.bf16.xpose.msk.msra.mxu0 %vm4253_vm3, %v3803_v30 }
 0xfb4   : > { %3806 = vmatprep.subr.bf16.mxu0 %v4052_v4 }
 0xfbb   : > { %3809 = vmatpush3.bf16.xpose.msk.msra.mxu0 %vm4253_vm3, %v3807_v38 }
 0xfbc   : > { %3810 = vmatprep.subr.bf16.mxu0 %v4052_v4 }
 0xfc3   : > { %3813 = vmatpush3.bf16.xpose.msk.msra.mxu0 %vm4253_vm3, %v3811_v41 }
 0xfc4   : > { %3612 = vmatprep.subr.mxu0 %v4054_v7 }
0x1030   : > { %v1738_v31 = vpop.xlane.xlu0 %1737 }
0x1031   : > { %v1739_v32 = vmul.f32 0.03125, %v1738_v31 }
0x1033   : > { %v1740_v33 = vsub.f32 %v1733_v19, %v1739_v32 }
0x1035   : > { %v1741_v34 = vmul.f32 %v1740_v33, %v1740_v33 }
0x1037   : > { %v1742_v35 = vsel %vm594_vm1, %v1741_v34, 0.0 }
0x1038   : > { %1743 = vadd.xlane.f32.xlu0 %v1742_v35 }
0x10c5   : > { %v1744_v42 = vpop.xlane.xlu0 %1743 }
0x10c6   : > { %v1745_v43 = vmul.f32 0.03125, %v1744_v42 }
0x10c8   : > { %v1746_v44 = vadd.f32 1e-05, %v1745_v43 }
0x10ca   : > { %3951 = vrsqrt.f32 %v1746_v44 }
0x10d4   : > { %v3952_v45 = vpop.eup %3951 }
0x10d5   : > { %v1748_v47 = vmul.f32 %v3952_v45, %v1740_v33 }
0x10d7   : > { %v1755_v49 = vmul.f32 %v3181_v46, %v1748_v47 }
0x10d9   : > { %v4616_v50 = vadd.f32 %v3182_v48, %v1755_v49 }
0x10db   : > { %3590 = vmatmul.mubr.msk.f32.vlgmr.msra.gmra.mrb[22].mxu0 %vm594_vm1, %v4616_v50 }
0x10dc   : > { %3614 = vmatprep.mubr.msk.f32.mxu0 %vm4053_vm0, %v4054_v7 }
0x11ae   : > { %v4622_v51 = vpop.f32.mrb[22].mxu0 }
0x11af   : > { %1887 = vrot.lane.b32.xlu0 %v4622_v51, %s4056_s22  ;;  %v3591_v52 = vpop.f32.mrb[23].mxu0  ;;  %v1885_v53 = vmul.f32 0.35355338, %v4622_v51  ;;  %s4969_s22 = smov 64  }
0x11b3   : > { %2054 = vrot.lane.b32.xlu0 %v4622_v51, %s4057_s30  ;;  %s4970_s30 = smov 72  }
0x11b7   : > { %2052 = vrot.lane.b32.xlu0 %v1885_v53, %s4060_s23  ;;  %s4972_s23 = smov 48  }
0x11bb   : > { %2220 = vrot.lane.b32.xlu0 %v4622_v51, %s4059_s29  ;;  %s4971_s29 = smov 56  }
0x11bf   : > { %2218 = vrot.lane.b32.xlu0 %v1885_v53, %s4061_s28  ;;  %s4973_s28 = smov 40  }
0x11c3   : > { %2384 = vrot.lane.b32.xlu0 %v1885_v53, %s4064_s16 }
0x1221   : > { %v1888_v54 = vpop.permute.xlu0 %1887 }
0x1222   : > { %3593 = vmatpush3.xpose.msk.msra.mxu1 %vm708_vm13, %v1888_v54 }
0x1223   : > { %3597 = vmatprep.subr.mxu1 %v4054_v7 }
0x1225   : > { %v2055_v56 = vpop.permute.xlu0 %2054  ;;  %3595 = vmatmul.mubr.msk.f32.vlgmr.msra.gmra.mrb[4].mxu1 %vm708_vm13, %v1885_v53 }
0x1226   : > { %3599 = vmatprep.mubr.msk.f32.mxu1 %vm4053_vm0, %v4054_v7 }
0x1229   : > { %v2053_v58 = vpop.permute.xlu0 %2052 }
0x122d   : > { %v2221_v59 = vpop.permute.xlu0 %2220 }
0x122e   : > { %3613 = vmatpush3.xpose.msk.msra.mxu0 %vm708_vm13, %v2221_v59 }
0x122f   : > { %3622 = vmatprep.subr.mxu0 %v4054_v7 }
0x1231   : > { %v2219_v60 = vpop.permute.xlu0 %2218 }
0x1232   : > { %3615 = vmatmul.mubr.msk.f32.vlgmr.msra.gmra.mrb[24].mxu0 %vm708_vm13, %v2219_v60  ;;  %v3222_v60 = vld [vmem:[%s4929_s4 + $0x30] sm:$0xff] }
0x1233   : > { %3624 = vmatprep.mubr.msk.f32.mxu0 %vm4053_vm0, %v4054_v7 }
0x1235   : > { %v2385_v14 = vpop.permute.xlu0 %2384 }
0x12f8   : > { %v1960_v61 = vpop.f32.mrb[4].mxu1 }
0x12f9   : > { %v1964_v62 = vsel %vm4247_vm2, %v1960_v61, -1e+30  ;;  %v3596_v63 = vpop.f32.mrb[5].mxu1  ;;  %v3223_v61 = vld [vmem:[%s4929_s4 + $0x38] sm:$0xff] }
0x12fa   : > { %v1965_v0 = vsel %vm708_vm13, %v1964_v62, -inf }
0x12fb   : > { %1966 = vmax.xlane.f32.xlu1 %v1965_v0 }
0x1305   : > { %v2292_v1 = vpop.f32.mrb[24].mxu0 }
0x1306   : > { %v2296_v2 = vsel %vm4247_vm2, %v2292_v1, -1e+30  ;;  %v3616_v57 = vpop.f32.mrb[25].mxu0 }
0x1307   : > { %v2297_v3 = vsel %vm708_vm13, %v2296_v2, -inf }
0x1308   : > { %2298 = vmax.xlane.f32.xlu0 %v2297_v3 }
0x130c   : > { %1976 = vrot.lane.b32.xlu1 %v4622_v51, %s4969_s22  ;;  %s4975_s22 = smov 16  }
0x1388   : > { %v1967_v5 = vpop.xlane.xlu1 %1966 }
0x1389   : > { %v1968_v6 = vsub.f32 %v1964_v62, %v1967_v5  ;;  %v3819_v62 = vpack.c.bf16 %v3223_v61, %v3222_v60  ;;  %v3232_v60 = vld [vmem:[%s4931_s6 + $0x1] ss:$0 sm:$0xff] }
0x138b   : > { %v1969_v8 = vmul.f32 1.442695, %v1968_v6 }
0x138c   : > { %v1977_v9 = vpop.permute.xlu1 %1976 }
0x138d   : > { %3953 = vpow2.f32 %v1969_v8  ;;  %3598 = vmatpush3.msra.mxu1 %v1977_v9 }
0x138e   : > { %3602 = vmatprep.subr.mxu1 %v4054_v7 }
0x1395   : > { %v2299_v20 = vpop.xlane.xlu0 %2298 }
0x1396   : > { %v2300_v21 = vsub.f32 %v2296_v2, %v2299_v20  ;;  %v3234_v20 = vld [vmem:[%s4932_s7 + $0x88] sm:$0xff] }
0x1397   : > { %v3954_v10 = vpop.eup %3953 }
0x1398   : > { %v1971_v11 = vsel %vm708_vm13, %v3954_v10, 0.0  ;;  %v2301_v22 = vmul.f32 1.442695, %v2300_v21 }
0x1399   : > { %1972 = vadd.xlane.f32.xlu1 %v1971_v11 }
0x13aa   : > { %2386 = vrot.lane.b32.xlu1 %v4622_v51, %s4970_s30  ;;  %s4976_s30 = smov 24  }
0x1426   : > { %v1973_v12 = vpop.xlane.xlu1 %1972 }
0x1427   : > { %3955 = vrcp.f32 %v1973_v12 }
0x1428   : > { %3957 = vpow2.f32 %v2301_v22  ;;  %v3235_v22 = vld [vmem:[%s4932_s7 + $0x90] sm:$0xff] }
0x142a   : > { %v2387_v13 = vpop.permute.xlu1 %2386 }
0x142b   : > { %3623 = vmatpush3.xpose.msk.msra.mxu0 %vm708_vm13, %v2387_v13 }
0x142c   : > { %3814 = vmatprep.subr.bf16.mxu0 %v4052_v4 }
0x142e   : > { %3625 = vmatmul.mubr.msk.f32.vlgmr.msra.gmra.mrb[26].mxu0 %vm708_vm13, %v2385_v14 }
0x142f   : > { %3640 = vmatprep.mubr.msk.f32.mxu0 %vm4053_vm0, %v4054_v7 }
0x1431   : > { %v3956_v18 = vpop.eup %3955 }
0x1432   : > { %v1975_v19 = vmul.f32 %v3956_v18, %v3954_v10  ;;  %v3958_v25 = vpop.eup %3957 }
0x1433   : > { %v2303_v27 = vsel %vm708_vm13, %v3958_v25, 0.0 }
0x1434   : > { %3600 = vmatmul.mubr.msk.f32.vlgmr.msra.gmra.mrb[6].mxu1 %vm708_vm13, %v1975_v19  ;;  %v3233_v19 = vld [vmem:[%s4932_s7 + $0x80] sm:$0xff] }
0x1435   : > { %3603 = vmatpush3.xpose.msk.msra.mxu1 %vm708_vm13, %v2055_v56  ;;  %3604 = vmatprep.mubr.msk.f32.mxu1 %vm4053_vm0, %v4054_v7  ;;  %v3220_v56 = vld [vmem:[%s4929_s4 + $0x20] sm:$0xff]  ;;  %v3823_v21 = vpack.c.bf16 %v3234_v20, %v3233_v19 }
0x1436   : > { %3607 = vmatprep.subr.mxu1 %v4054_v7 }
0x1438   : > { %3605 = vmatmul.mubr.msk.f32.vlgmr.msra.gmra.mrb[8].mxu1 %vm708_vm13, %v2053_v58  ;;  %v3221_v58 = vld [vmem:[%s4929_s4 + $0x28] sm:$0xff] }
0x1439   : > { %3609 = vmatprep.mubr.msk.f32.mxu1 %vm4053_vm0, %v4054_v7  ;;  %v3815_v59 = vpack.c.bf16 %v3221_v58, %v3220_v56  ;;  %v3231_v58 = vld [vmem:[%s4930_s5 + $0x1] ss:$0 sm:$0xff] }
0x143b   : > { %3817 = vmatpush3.bf16.xpose.msk.msra.mxu0 %vm4253_vm3, %v3815_v59 }
0x143c   : > { %3818 = vmatprep.subr.bf16.mxu0 %v4052_v4 }
0x1443   : > { %3821 = vmatpush3.bf16.xpose.msk.msra.mxu0 %vm4253_vm3, %v3819_v62 }
0x1444   : > { %3854 = vmatprep.subr.bf16.mxu0 %v4052_v4 }
0x1501   : > { %v2458_v23 = vpop.f32.mrb[26].mxu0 }
0x1502   : > { %v2462_v55 = vsel %vm4247_vm2, %v2458_v23, -1e+30  ;;  %v3626_v24 = vpop.f32.mrb[27].mxu0  ;;  %v3236_v23 = vld [vmem:[%s4932_s7 + $0x98] sm:$0xff] }
0x1503   : > { %v2463_v15 = vsel %vm708_vm13, %v2462_v55, -inf  ;;  %v3237_v24 = vld [vmem:[%s4932_s7 + $0xa0] sm:$0xff] }
0x1504   : > { %2464 = vmax.xlane.f32.xlu0 %v2463_v15  ;;  %v3238_v15 = vld [vmem:[%s4932_s7 + $0xa8] sm:$0xff] }
0x1507   : > { %v4672_v26 = vpop.f32.mrb[6].mxu1 }
0x1508   : > { %v3601_v28 = vpop.f32.mrb[7].mxu1  ;;  %2304 = vadd.xlane.f32.xlu0 %v2303_v27  ;;  %v3240_v27 = vld [vmem:[%s4932_s7 + $0xb8] sm:$0xff] }
0x150b   : > { %v2126_v29 = vpop.f32.mrb[8].mxu1 }
0x150c   : > { %v2130_v30 = vsel %vm4247_vm2, %v2126_v29, -1e+30  ;;  %v3606_v31 = vpop.f32.mrb[9].mxu1  ;;  %v3241_v29 = vld [vmem:[%s4932_s7 + $0xc0] sm:$0xff] }
0x150d   : > { %v2131_v32 = vsel %vm708_vm13, %v2130_v30, -inf }
0x150e   : > { %2132 = vmax.xlane.f32.xlu1 %v2131_v32  ;;  %v3243_v32 = vld [vmem:[%s4932_s7 + $0xd0] sm:$0xff] }
0x151e   : > { %2142 = vrot.lane.b32.xlu0 %v4622_v51, %s4971_s29 }
0x1591   : > { %v2465_v33 = vpop.xlane.xlu0 %2464 }
0x1592   : > { %v2466_v34 = vsub.f32 %v2462_v55, %v2465_v33  ;;  %v3827_v55 = vpack.c.bf16 %v3236_v23, %v3235_v22  ;;  %v3244_v33 = vld [vmem:[%s4932_s7 + $0xd8] sm:$0xff]  ;;  %v2953_v23 = vld [vmem:[%s4938_s13 + $0x20] sm:$0xff] }
0x1594   : > { %v2467_v35 = vmul.f32 1.442695, %v2466_v34  ;;  %v3843_v34 = vpack.c.bf16 %v3244_v33, %v3243_v32  ;;  %v3277_v32 = vld [vmem:[%s4937_s12 + $0x1] ss:$0 sm:$0xff] }
0x1595   : > { %v2305_v36 = vpop.xlane.xlu0 %2304 }
0x1596   : > { %3959 = vpow2.f32 %v2467_v35 }
0x1599   : > { %v2143_v37 = vpop.permute.xlu0 %2142 }
0x159a   : > { %3608 = vmatpush3.msra.mxu1 %v2143_v37 }
0x159b   : > { %3617 = vmatprep.subr.mxu1 %v4054_v7  ;;  %v2133_v39 = vpop.xlane.xlu1 %2132 }
0x159c   : > { %v2134_v40 = vsub.f32 %v2130_v30, %v2133_v39  ;;  %v3242_v30 = vld [vmem:[%s4932_s7 + $0xc8] sm:$0xff]  ;;  %v3245_v39 = vld [vmem:[%s4932_s7 + $0xe0] sm:$0xff] }
0x159d   : > { %v3839_v31 = vpack.c.bf16 %v3242_v30, %v3241_v29 }
0x159e   : > { %v2135_v41 = vmul.f32 1.442695, %v2134_v40  ;;  %v3246_v40 = vld [vmem:[%s4932_s7 + $0xe8] sm:$0xff] }
0x15a0   : > { %v3960_v38 = vpop.eup %3959  ;;  %3961 = vpow2.f32 %v2135_v41  ;;  %v3847_v41 = vpack.c.bf16 %v3246_v40, %v3245_v39 }
0x15a1   : > { %v2469_v16 = vsel %vm708_vm13, %v3960_v38, 0.0 }
0x15a2   : > { %2470 = vadd.xlane.f32.xlu1 %v2469_v16 }
0x15aa   : > { %v3962_v42 = vpop.eup %3961 }
0x15ab   : > { %v2137_v43 = vsel %vm708_vm13, %v3962_v42, 0.0 }
0x15b3   : > { %2308 = vrot.lane.b32.xlu1 %v4622_v51, %s4972_s23 }
0x15d7   : > { %2138 = vadd.xlane.f32.xlu1 %v2137_v43  ;;  %v3248_v43 = vld [vmem:[%s4932_s7 + $0xf8] sm:$0xff] }
0x15e8   : > { %2474 = vrot.lane.b32.xlu1 %v4622_v51, %s4973_s28 }
0x162f   : > { %v2471_v44 = vpop.xlane.xlu1 %2470 }
0x1633   : > { %v2309_v45 = vpop.permute.xlu1 %2308 }
0x1664   : > { %v2139_v46 = vpop.xlane.xlu1 %2138 }
0x1665   : > { %3963 = vrcp.f32 %v2139_v46  ;;  %v3269_v46 = vld [vmem:[%s4934_s9 + $0x28] sm:$0xff] }
0x1666   : > { %3965 = vrcp.f32 %v2305_v36 }
0x1667   : > { %3967 = vrcp.f32 %v2471_v44 }
0x1668   : > { %v2475_v51 = vpop.permute.xlu1 %2474 }
0x166f   : > { %v3964_v47 = vpop.eup %3963 }
0x1670   : > { %v2141_v48 = vmul.f32 %v3964_v47, %v3962_v42  ;;  %v3966_v49 = vpop.eup %3965  ;;  %v3247_v42 = vld [vmem:[%s4932_s7 + $0xf0] sm:$0xff] }
0x1671   : > { %v2307_v52 = vmul.f32 %v3966_v49, %v3958_v25  ;;  %v3968_v53 = vpop.eup %3967  ;;  %v3831_v25 = vpack.c.bf16 %v3238_v15, %v3237_v24  ;;  %v3851_v44 = vpack.c.bf16 %v3248_v43, %v3247_v42  ;;  %v3271_v49 = vld [vmem:[%s4934_s9 + $0x38] sm:$0xff]  ;;  %v2955_v15 = vld [vmem:[%s4938_s13 + $0x30] sm:$0xff] }
0x1672   : > { %3610 = vmatmul.mubr.msk.f32.vlgmr.msra.gmra.mrb[10].mxu1 %vm708_vm13, %v2141_v48  ;;  %v2473_v54 = vmul.f32 %v3968_v53, %v3960_v38  ;;  %v3270_v48 = vld [vmem:[%s4934_s9 + $0x30] sm:$0xff] }
0x1673   : > { %3618 = vmatpush3.msra.mxu1 %v2309_v45  ;;  %3619 = vmatprep.mubr.msk.f32.mxu1 %vm4053_vm0, %v4054_v7  ;;  %v3268_v45 = vld [vmem:[%s4934_s9 + $0x20] sm:$0xff] }
0x1674   : > { %3627 = vmatprep.subr.mxu1 %v4054_v7  ;;  %v3855_v47 = vpack.c.bf16 %v3269_v46, %v3268_v45 }
0x1676   : > { %3620 = vmatmul.mubr.msk.f32.vlgmr.msra.gmra.mrb[12].mxu1 %vm708_vm13, %v2307_v52  ;;  %v3858_v52 = vpack.c.bf16 %v3271_v49, %v3270_v48 }
0x1677   : > { %3628 = vmatpush3.msra.mxu1 %v2475_v51  ;;  %3629 = vmatprep.mubr.msk.f32.mxu1 %vm4053_vm0, %v4054_v7 }
0x1678   : > { %3822 = vmatprep.subr.bf16.mxu1 %v4052_v4 }
0x167a   : > { %3630 = vmatmul.mubr.msk.f32.vlgmr.msra.gmra.mrb[14].mxu1 %vm708_vm13, %v2473_v54 }
0x167b   : > { %3675 = vmatprep.mubr.msk.f32.mxu1 %vm4053_vm0, %v4054_v7 }
0x167e   : > { %3825 = vmatpush3.bf16.xpose.msk.msra.mxu1 %vm4253_vm3, %v3823_v21 }
0x167f   : > { %3826 = vmatprep.subr.bf16.mxu1 %v4052_v4 }
0x1686   : > { %3829 = vmatpush3.bf16.xpose.msk.msra.mxu1 %vm4253_vm3, %v3827_v55  ;;  %v2954_v55 = vld [vmem:[%s4938_s13 + $0x28] sm:$0xff] }
0x1687   : > { %3830 = vmatprep.subr.bf16.mxu1 %v4052_v4  ;;  %v3869_v24 = vpack.c.bf16 %v2954_v55, %v2953_v23 }
0x168e   : > { %3833 = vmatpush3.bf16.xpose.msk.msra.mxu1 %vm4253_vm3, %v3831_v25  ;;  %v2956_v25 = vld [vmem:[%s4938_s13 + $0x38] sm:$0xff] }
0x168f   : > { %3834 = vmatprep.subr.bf16.mxu1 %v4052_v4 }
0x1745   : > { %v2214_v63 = vpop.f32.mrb[10].mxu1 }
0x1746   : > { %2551 = vrot.lane.b32.xlu0 %v2214_v63, %s4974_s15  ;;  %v3611_v0 = vpop.f32.mrb[11].mxu1  ;;  %v3250_v63 = vld [vmem:[%s4933_s8 + $0x1] ss:$0 sm:$0xff]  ;;  %s3989_s15 = sshll.u32 %s4069_s27, 4  ;;  %s3990_s15 = int_to_ptr.vmem [resolvable:$false] %s3989_s15 }
0x1749   : > { %v2380_v1 = vpop.f32.mrb[12].mxu1 }
0x174a   : > { %2555 = vrot.lane.b32.xlu1 %v2380_v1, %s4975_s22  ;;  %v3621_v2 = vpop.f32.mrb[13].mxu1  ;;  %s450_s22 = sand.u32 1, %s4041_s24  }
0x174b   : > { %s3063_s25 = scalar_lea.sflag [#allocation5], %s450_s22 }
0x174d   : > { %v2546_v57 = vpop.f32.mrb[14].mxu1 }
0x174e   : > { %2559 = vrot.lane.b32.xlu0 %v2546_v57, %s4976_s30  ;;  %v3631_v3 = vpop.f32.mrb[15].mxu1  ;;  %s3126_s30 = sshll.u32 %s450_s22, 3 }
0x174f   : > { %v3273_v3 = vld [vmem:[%s4935_s10 + $0x1] ss:$0 sm:$0xff]  ;;  %s452_s28 = scalar_lea.vmem [#allocation4], %s3126_s30  ;;  %s3991_s30 = scalar_lea.vmem %s3990_s15, 256 }
0x1750   : > { %s3076_s16 = sshll.u32 %s452_s28, 4  ;;  %s4884_s16 = int_to_ptr.vmem [resolvable:$true] %s3076_s16 }
0x1751   : > { %s3985_s21 = scalar_lea.vmem %s4884_s16, 128  ;;  %p3992_p4 = scmp.lt.s32.totalorder %s4884_s16, %s3990_s15 }
0x1752   : > { %p3986_p1 = scmp.ne.s32.totalorder %s4884_s16, %s3985_s21  ;;  %p3993_p5 = scmp.lt.s32.totalorder %s3991_s30, %s3985_s21 }
0x1754   : > { %p3987_p2 = pnand %p3986_p1, %p4188_p10  ;;  %p3994_p6 = por %p3993_p5, %p3992_p4 }
0x1756   : > { %p3988_p3 = pneg %p3987_p2 }
0x1758   : > { %p3995_p7 = pnand %p3994_p6, %p3988_p3 }
0x17b8   : > { %v2552_v5 = vpop.permute.xlu0 %2551 }
0x17b9   : > { %v2562_v8 = vsel %vm708_vm13, %v4672_v26, %v2552_v5  ;;  %v3239_v26 = vld [vmem:[%s4932_s7 + $0xb0] sm:$0xff] }
0x17ba   : > { %v3835_v28 = vpack.c.bf16 %v3240_v27, %v3239_v26  ;;  %v3873_v26 = vpack.c.bf16 %v2956_v25, %v2955_v15 }
0x17bc   : > { %v2556_v6 = vpop.permute.xlu1 %2555  ;;  %3837 = vmatpush3.bf16.xpose.msk.msra.mxu1 %vm4253_vm3, %v3835_v28 }
0x17bd   : > { %v2563_v9 = vsel %vm1383_vm14, %v2562_v8, %v2556_v6  ;;  %3838 = vmatprep.subr.bf16.mxu1 %v4052_v4 }
0x17c0   : > { %v2560_v10 = vpop.permute.xlu0 %2559 }
0x17c1   : > { %v2564_v11 = vsel %vm1385_vm15, %v2563_v9, %v2560_v10 }
0x17c2   : > { %3641 = vmatmul.mubr.msk.f32.vlgmr.msra.gmra.mrb[28].mxu0 %vm594_vm1, %v2564_v11  ;;  %v2949_v11 = vld [vmem:[%s4938_s13] sm:$0xff] }
0x17c3   : > { %3686 = vmatprep.mubr.msk.f32.mxu0 %vm4053_vm0, %v4054_v7  ;;  %3856 = vmatpush3.bf16.xpose.msra.mxu0 %v3855_v47 }
0x17c4   : > { %3841 = vmatpush3.bf16.xpose.msk.msra.mxu1 %vm4253_vm3, %v3839_v31  ;;  %3857 = vmatprep.subr.bf16.mxu0 %v4052_v4 }
0x17c5   : > { %3842 = vmatprep.subr.bf16.mxu1 %v4052_v4 }
0x17cb   : > { %3859 = vmatpush3.bf16.xpose.msra.mxu0 %v3858_v52 }
0x17cc   : > { %3845 = vmatpush3.bf16.xpose.msk.msra.mxu1 %vm4253_vm3, %v3843_v34  ;;  %3860 = vmatprep.subr.bf16.mxu0 %v4052_v4 }
0x17cd   : > { %3846 = vmatprep.subr.bf16.mxu1 %v4052_v4 }
0x17d4   : > { %3849 = vmatpush3.bf16.xpose.msk.msra.mxu1 %vm4253_vm3, %v3847_v41 }
0x17d5   : > { %3850 = vmatprep.subr.bf16.mxu1 %v4052_v4 }
0x17dc   : > { %3853 = vmatpush3.bf16.xpose.msk.msra.mxu1 %vm4253_vm3, %v3851_v44 }
0x1895   : > { %v2651_v12 = vpop.f32.mrb[28].mxu0 }
0x1896   : > { %v2655_v13 = vadd.f32 %v2651_v12, %v4616_v50  ;;  %v3642_v14 = vpop.f32.mrb[29].mxu0 }
0x1898   : > { %v2660_v18 = vsel %vm594_vm1, %v2655_v13, 0.0 }
0x1899   : > { %2661 = vadd.xlane.f32.xlu1 %v2660_v18 }
0x1926   : > { %v2662_v35 = vpop.xlane.xlu1 %2661 }
0x1927   : > { %v2663_v36 = vmul.f32 0.03125, %v2662_v35 }
0x1929   : > { %v2664_v37 = vsub.f32 %v2655_v13, %v2663_v36  ;;  %v2952_v13 = vld [vmem:[%s4938_s13 + $0x18] sm:$0xff] }
0x192b   : > { %v2665_v38 = vmul.f32 %v2664_v37, %v2664_v37 }
0x192d   : > { %v2666_v16 = vsel %vm594_vm1, %v2665_v38, 0.0 }
0x192e   : > { %2667 = vadd.xlane.f32.xlu0 %v2666_v16 }
0x19bb   : > { %v2668_v53 = vpop.xlane.xlu0 %2667 }
0x19bc   : > { %v2669_v51 = vmul.f32 0.03125, %v2668_v53 }
0x19be   : > { %v2670_v54 = vadd.f32 1e-05, %v2669_v51 }
0x19c0   : > { %3969 = vrsqrt.f32 %v2670_v54 }
0x19ca   : > { %v3970_v56 = vpop.eup %3969 }
0x19cb   : > { %v2672_v59 = vmul.f32 %v3970_v56, %v2664_v37 }
0x19cd   : > { %v2679_v61 = vmul.f32 %v3231_v58, %v2672_v59 }
0x19cf   : > { %v2686_v62 = vadd.f32 %v3232_v60, %v2679_v61 }
0x19d1   : > { %3676 = vmatmul.mubr.msk.f32.vlgmr.msra.gmra.mrb[16].mxu1 %vm594_vm1, %v2686_v62 }
0x1aa4   : > { %v2829_v0 = vpop.f32.mrb[16].mxu1 }
0x1aa5   : > { %v2830_v1 = vadd.f32 %v3250_v63, %v2829_v0  ;;  %v3677_v2 = vpop.f32.mrb[17].mxu1 }
0x1aa7   : > { %v2833_v57 = vmax.f32 %v2830_v1, 0.0 }
0x1aa9   : > { %3687 = vmatmul.mubr.f32.vlgmr.msra.gmra.mrb[30].mxu0 %v2833_v57 }
0x1aaa   : > { %3705 = vmatprep.mubr.msk.f32.mxu0 %vm4053_vm0, %v4054_v7  ;;  %v2950_v7 = vld [vmem:[%s4938_s13 + $0x8] sm:$0xff] }
0x1aab   : > { %v3861_v12 = vpack.c.bf16 %v2950_v7, %v2949_v11 }
0x1aad   : > { %3863 = vmatpush3.bf16.xpose.msk.msra.mxu0 %vm4253_vm3, %v3861_v12 }
0x1aae   : > { %3864 = vmatprep.subr.bf16.mxu0 %v4052_v4 }
0x1b7c   : > { %v2913_v5 = vpop.f32.mrb[30].mxu0 }
0x1b7d   : > { %v2914_v6 = vadd.f32 %v3273_v3, %v2913_v5  ;;  %v3688_v8 = vpop.f32.mrb[31].mxu0 }
0x1b7f   : > { %v2917_v9 = vadd.f32 %v2914_v6, %v4616_v50  ;;  %v2951_v50 = vld [vmem:[%s4938_s13 + $0x10] sm:$0xff] }
0x1b80   : > { %v3865_v14 = vpack.c.bf16 %v2952_v13, %v2951_v50 }
0x1b81   : > { %v2922_v10 = vsel %vm594_vm1, %v2917_v9, 0.0 }
0x1b82   : > { %2923 = vadd.xlane.f32.xlu0 %v2922_v10  ;;  %3867 = vmatpush3.bf16.xpose.msk.msra.mxu0 %vm4253_vm3, %v3865_v14 }
0x1b83   : > { %3868 = vmatprep.subr.bf16.mxu0 %v4052_v4 }
0x1b8a   : > { %3871 = vmatpush3.bf16.xpose.msk.msra.mxu0 %vm4253_vm3, %v3869_v24 }
0x1b8b   : > { %3872 = vmatprep.subr.bf16.mxu0 %v4052_v4  ;;  %v3276_v4 = vld [vmem:[%s4936_s11 + $0x1] ss:$0 sm:$0xff] }
0x1b92   : > { %3875 = vmatpush3.bf16.xpose.msk.msra.mxu0 %vm4253_vm3, %v3873_v26 }
0x1c0f   : > { %v2924_v18 = vpop.xlane.xlu0 %2923 }
0x1c10   : > { %v2925_v19 = vmul.f32 0.03125, %v2924_v18 }
0x1c12   : > { %v2926_v20 = vsub.f32 %v2917_v9, %v2925_v19 }
0x1c14   : > { %v2927_v21 = vmul.f32 %v2926_v20, %v2926_v20 }
0x1c16   : > { %v2928_v22 = vsel %vm594_vm1, %v2927_v21, 0.0 }
0x1c17   : > { %2929 = vadd.xlane.f32.xlu1 %v2928_v22 }
0x1ca4   : > { %v2930_v27 = vpop.xlane.xlu1 %2929 }
0x1ca5   : > { %v2931_v28 = vmul.f32 0.03125, %v2930_v27 }
0x1ca7   : > { %v2932_v29 = vadd.f32 1e-05, %v2931_v28 }
0x1ca9   : > { %3971 = vrsqrt.f32 %v2932_v29 }
0x1cb3   : > { %v3972_v30 = vpop.eup %3971 }
0x1cb4   : > { %v2934_v31 = vmul.f32 %v3972_v30, %v2926_v20 }
0x1cb6   : > { %v2941_v33 = vmul.f32 %v3276_v4, %v2934_v31 }
0x1cb8   : > { %v2948_v34 = vadd.f32 %v3277_v32, %v2941_v33 }
0x1cba   : > { %3706 = vmatmul.mubr.msk.f32.vlgmr.msra.gmra.mrb[32].mxu0 %vm594_vm1, %v2948_v34 }
0x1d8d   : > { %v3057_v35 = vpop.f32.mrb[32].mxu0 }
0x1d8e   : > { %v3058_v36 = vadd.f32 %v3278_v17, %v3057_v35  ;;  %v3707_v37 = vpop.f32.mrb[33].mxu0 }
0x1d90   : > { %3061 = vst.msk [vmem:[%s452_s28] sm:$0xff] %vm505_vm11, %v3058_v36 }
0x1d91   : > { %3998 = shalt.err (!%p3995_p7)
}
0x1d92   : > { %s3999_s19 = scalar_lea.hbm %s4882_s26, 128  ;;  %s4003_s23 = scalar_lea.hbm %s4977_s20, 256 }
0x1d93   : > { %p4000_p8 = scmp.ne.s32.totalorder %s4882_s26, %s3999_s19  ;;  %p4004_p13 = scmp.lt.u32.totalorder %s4882_s26, %s4977_s20 }
0x1d94   : > { %p4005_p0 = scmp.lt.u32.totalorder %s4003_s23, %s3999_s19  ;;  %p4007_p2 = scmp.lt.u32.totalorder %s3999_s19, %s4882_s26 }
0x1d95   : > { %p4001_p9 = pnand %p4000_p8, %p4188_p10 }
0x1d96   : > { %p4006_p1 = por %p4005_p0, %p4004_p13 }
0x1d97   : > { %p4002_p12 = pneg %p4001_p9 }
0x1d98   : > { %p4008_p3 = por %p4007_p2, %p4006_p1 }
0x1d9a   : > { %p4009_p4 = pnand %p4008_p3, %p4002_p12 }
0x1d9c   : > { %4012 = shalt.err (!%p4009_p4)
}
0x1d9d   : > { %3876 = dma.vmem_to_hbm [thread:$0]  (%p4188_p10), %s4884_s16, 128, %s4882_s26, %s3063_s25  }
0x1d9e PF: > { %s4978_s18 = sld [smem:[#allocation10_spill]]  ;;  %s4979_s21 = sld [smem:[#allocation8_spill]] }
0x1da4   : > { %p3882_p5 = scmp.ge.s32.totalorder %s4978_s18, 2  ;;  %s3088_s15 = sand.u32 1, %s4979_s21  }
0x1da5   : > { %s3089_s30 = scalar_lea.sflag [#allocation5], %s3088_s15 }
0x1da6   : > { %p3879_p6 = pnand %p3882_p5, %p4192_p11 }
0x1da8   : > { %4032 = dma.done.wait (!%p3879_p6), %s3089_s30, 128  }
0x1da9   : > { %4034 = vsyncadd (!%p3879_p6), %s3089_s30, 4294967168  ;;  %s4981_s25 = sld [smem:[#allocation11_spill]]  ;;  %s4982_s19 = sld [smem:[#allocation9_spill]] }
0x1daa   : > { %s4983_s0 = sld [smem:[#allocation12_spill]]  ;;  %s4984_s23 = smov %s4041_s24 }
0x1daf   : > { %p31_p7 = scmp.ge.s32.totalorder %s4981_s25, 4   ;;  %s4985_s24 = smov %s4982_s19 }
0x1db1   :  { %33 = sbr.rel (!%p31_p7) target bundleno = 18 (0x12), region = 118 }
0x1db8   :  { %3094 = vsyncpa [#allocation5], 1 }
0x1db9   :  { %3096 = vsyncpa [#allocation5 + $0x1], 1 }

</bundles_post_ra>
